<compile_context>
chip_gen: v6e
topology: v6e:2x2x1
jax: 0.10.0
libtpu: 0.0.40
codegen_flags: <defaults>
</compile_context>

<pallas_src>
import jax
import jax.numpy as jnp
from jax.experimental import pallas as pl
from jax.experimental.pallas import tpu as pltpu


def _make_kernel(F: int):
    """Kernel body for a fixed feature count F (attention seq-len == Linear fan-in)."""

    def kernel(params_ref, xt_ref, out_ref):
        # SMEM scalar layout:
        #   [0..2]  wq, wk, wv      (in_proj weights, embed_dim == 1)
        #   [3..5]  bq, bk, bv      (in_proj biases)
        #   [6..7]  w_out, b_out    (attn out_proj: 1x1 linear)
        #   [8]     b_lin           (final Linear bias)
        #   [9..9+F-1]  lin_w[f]    (final Linear weights)
        wq = params_ref[0]; wk = params_ref[1]; wv = params_ref[2]
        bq = params_ref[3]; bk = params_ref[4]; bv = params_ref[5]
        w_out = params_ref[6]; b_out = params_ref[7]
        b_lin = params_ref[8]

        xt = xt_ref[...]                     # (F, bb): features on sublanes, batch on lanes
        # head_dim == 1 -> 1/sqrt(head_dim) == 1, scale omitted.
        q = wq * xt + bq                     # (F, bb)
        k = wk * xt + bk                     # (F, bb)
        v = wv * xt + bv                     # (F, bb)

        bb = xt_ref.shape[1]
        acc = jnp.zeros((1, bb), jnp.float32)

        # Flash-style loop over query positions: s/p are only ever (F, bb),
        # softmax divide is fused into a single (1, bb) divide, and the
        # Linear(num_feature, 1) weight is folded in as a scalar multiply.
        # F is small and static here; for large F switch to lax.fori_loop
        # and/or add a query grid axis.
        for i in range(F):
            q_i = q[i:i + 1, :]                                # (1, bb)
            s_i = q_i * k                                      # (F, bb): s[j, b] = q_i[b] * k[j, b]
            m_i = jnp.max(s_i, axis=0, keepdims=True)          # (1, bb)
            p_i = jnp.exp(s_i - m_i)                           # (F, bb)
            denom = jnp.sum(p_i, axis=0, keepdims=True)        # (1, bb)
            num = jnp.sum(p_i * v, axis=0, keepdims=True)      # (1, bb)
            ctx_i = num / denom                                # fused softmax normalization
            attn_i = w_out * ctx_i + b_out                     # out_proj (1 -> 1 linear)
            acc = acc + params_ref[9 + i] * attn_i             # Linear weight fold-in

        logit = acc + b_lin                                    # (1, bb)
        out_ref[...] = 1.0 / (1.0 + jnp.exp(-logit))           # sigmoid, lane-dense store

    return kernel


def model_forward(x, params, lin_w):
    """x: (B, F) float32 -> score: (B,) float32 (matches Model.forward)."""
    x = x.astype(jnp.float32)
    B, F = x.shape

    # Single copy of x in seq-major layout (batch on lanes).
    xt = x.T                                                    # (F, B)

    # All scalar parameters + Linear weights packed together in SMEM.
    packed = jnp.concatenate(
        [params.astype(jnp.float32), lin_w.reshape(-1).astype(jnp.float32)])

    # Batch tiling: one block for small B; 128-wide lane tiles for large B so
    # the BlockSpec lane dim is either == B or a multiple of 128 and the
    # "parallel" grid axis can spread batches across TensorCores.
    if B > 128 and B % 128 == 0:
        bb = 128
    else:
        bb = B
    nb = B // bb

    out = pl.pallas_call(
        _make_kernel(F),
        out_shape=jax.ShapeDtypeStruct((nb, bb), jnp.float32),
        grid=(nb,),
        in_specs=[
            pl.BlockSpec(memory_space=pltpu.MemorySpace.SMEM),   # packed scalars + lin_w
            pl.BlockSpec((F, bb), lambda i: (0, i)),             # x^T batch tile (VMEM)
        ],
        out_specs=pl.BlockSpec((1, bb), lambda i: (i, 0)),       # lane-dense logits
        compiler_params=pltpu.CompilerParams(
            dimension_semantics=("parallel",)),
    )(packed, xt)
    return out.reshape(B)


def reference_forward(x, params, lin_w):
    """Pure-JAX reference mirroring the PyTorch forward."""
    wq, wk, wv, bq, bk, bv, w_out, b_out, b_lin = [params[i] for i in range(9)]
    q = wq * x + bq
    k = wk * x + bk
    v = wv * x + bv
    s = q[:, :, None] * k[:, None, :]
    a = jax.nn.softmax(s, axis=-1)
    ctx = jnp.einsum("bij,bj->bi", a, v)
    attn_out = w_out * ctx + b_out
    logit = attn_out @ lin_w + b_lin
    return jax.nn.sigmoid(logit)


if __name__ == "__main__":
    B, F = 4, 16  # batch=4, num_feature=16
    key = jax.random.PRNGKey(0)
    k_x, k_inw, k_inb, k_ow, k_ob, k_lw, k_lb = jax.random.split(key, 7)

    x = jax.random.normal(k_x, (B, F), dtype=jnp.float32)

    # Deterministic synthetic parameters (shapes follow nn.MultiheadAttention
    # with embed_dim=1/num_heads=1 and nn.Linear(num_feature, 1)).
    in_proj_w = jax.random.normal(k_inw, (3,), dtype=jnp.float32) * 0.7  # (3*E, E) with E=1
    in_proj_b = jax.random.normal(k_inb, (3,), dtype=jnp.float32) * 0.1
    out_w = jax.random.normal(k_ow, (), dtype=jnp.float32) * 0.7         # out_proj (1,1)
    out_b = jax.random.normal(k_ob, (), dtype=jnp.float32) * 0.1
    lin_w = jax.random.normal(k_lw, (F,), dtype=jnp.float32) * 0.3       # Linear weight (1,F)
    lin_b = jax.random.normal(k_lb, (), dtype=jnp.float32) * 0.1

    params = jnp.array(
        [in_proj_w[0], in_proj_w[1], in_proj_w[2],
         in_proj_b[0], in_proj_b[1], in_proj_b[2],
         out_w, out_b, lin_b], dtype=jnp.float32)

    score = jax.block_until_ready(model_forward(x, params, lin_w))
    ref = reference_forward(x, params, lin_w)

    assert score.shape == (B,), score.shape
    assert jnp.allclose(score, ref, atol=1e-5, rtol=1e-5), (score, ref)
    # TODO(synk): self.loss (binary_cross_entropy) is unused in forward(); not implemented.
    print("KERNEL_OK")
</pallas_src>

<mosaic_0001>
module attributes {stable_mosaic.version = 11 : i64} {
  func.func @kernel(%arg0: i32, %arg1: memref<25xf32, #tpu.memory_space<smem>>, %arg2: memref<16x4xf32, #tpu.memory_space<vmem>>, %arg3: memref<1x4xf32, #tpu.memory_space<vmem>>) attributes {dimension_semantics = [#tpu.dimension_semantics<parallel>], iteration_bounds = array<i64: 1>, scalar_prefetch = 0 : i64, scratch_operands = 0 : i64, tpu.core_type = #tpu.core_type<tc>, window_params = [{transform_indices = @transform_0, window_bounds = array<i64: 25>}, {transform_indices = @transform_1, window_bounds = array<i64: 16, 4>}, {transform_indices = @transform_2, window_bounds = array<i64: 1, 4>}]} {
    %c0 = arith.constant 0 : index
    %0 = memref.load %arg1[%c0] : memref<25xf32, #tpu.memory_space<smem>>
    %c1 = arith.constant 1 : index
    %1 = memref.load %arg1[%c1] : memref<25xf32, #tpu.memory_space<smem>>
    %c2 = arith.constant 2 : index
    %2 = memref.load %arg1[%c2] : memref<25xf32, #tpu.memory_space<smem>>
    %c3 = arith.constant 3 : index
    %3 = memref.load %arg1[%c3] : memref<25xf32, #tpu.memory_space<smem>>
    %c4 = arith.constant 4 : index
    %4 = memref.load %arg1[%c4] : memref<25xf32, #tpu.memory_space<smem>>
    %c5 = arith.constant 5 : index
    %5 = memref.load %arg1[%c5] : memref<25xf32, #tpu.memory_space<smem>>
    %c6 = arith.constant 6 : index
    %6 = memref.load %arg1[%c6] : memref<25xf32, #tpu.memory_space<smem>>
    %c7 = arith.constant 7 : index
    %7 = memref.load %arg1[%c7] : memref<25xf32, #tpu.memory_space<smem>>
    %c8 = arith.constant 8 : index
    %8 = memref.load %arg1[%c8] : memref<25xf32, #tpu.memory_space<smem>>
    %c0_0 = arith.constant 0 : index
    %c0_1 = arith.constant 0 : index
    %9 = vector.load %arg2[%c0_0, %c0_1] : memref<16x4xf32, #tpu.memory_space<vmem>>, vector<16x4xf32>
    %10 = vector.broadcast %0 : f32 to vector<16x4xf32>
    %11 = arith.mulf %10, %9 : vector<16x4xf32>
    %12 = vector.broadcast %3 : f32 to vector<16x4xf32>
    %13 = arith.addf %11, %12 : vector<16x4xf32>
    %14 = vector.broadcast %1 : f32 to vector<16x4xf32>
    %15 = arith.mulf %14, %9 : vector<16x4xf32>
    %16 = vector.broadcast %4 : f32 to vector<16x4xf32>
    %17 = arith.addf %15, %16 : vector<16x4xf32>
    %18 = vector.broadcast %2 : f32 to vector<16x4xf32>
    %19 = arith.mulf %18, %9 : vector<16x4xf32>
    %20 = vector.broadcast %5 : f32 to vector<16x4xf32>
    %21 = arith.addf %19, %20 : vector<16x4xf32>
    %cst = arith.constant 0.000000e+00 : f32
    %22 = vector.broadcast %cst : f32 to vector<1x4xf32>
    %23 = vector.extract_strided_slice %13 {offsets = [0, 0], sizes = [1, 4], strides = [1, 1]} : vector<16x4xf32> to vector<1x4xf32>
    %24 = vector.broadcast %23 : vector<1x4xf32> to vector<16x4xf32>
    %25 = arith.mulf %24, %17 : vector<16x4xf32>
    %cst_2 = arith.constant dense<0xFF800000> : vector<4xf32>
    %26 = vector.multi_reduction <maximumf>, %25, %cst_2 [0] : vector<16x4xf32> to vector<4xf32>
    %27 = vector.shape_cast %26 : vector<4xf32> to vector<1x4xf32>
    %28 = vector.broadcast %27 : vector<1x4xf32> to vector<16x4xf32>
    %29 = arith.subf %25, %28 : vector<16x4xf32>
    %30 = math.exp %29 : vector<16x4xf32>
    %cst_3 = arith.constant dense<0.000000e+00> : vector<4xf32>
    %31 = vector.multi_reduction <add>, %30, %cst_3 [0] : vector<16x4xf32> to vector<4xf32>
    %32 = vector.shape_cast %31 : vector<4xf32> to vector<1x4xf32>
    %33 = arith.mulf %30, %21 : vector<16x4xf32>
    %cst_4 = arith.constant dense<0.000000e+00> : vector<4xf32>
    %34 = vector.multi_reduction <add>, %33, %cst_4 [0] : vector<16x4xf32> to vector<4xf32>
    %35 = vector.shape_cast %34 : vector<4xf32> to vector<1x4xf32>
    %36 = arith.divf %35, %32 : vector<1x4xf32>
    %37 = vector.broadcast %6 : f32 to vector<1x4xf32>
    %38 = arith.mulf %37, %36 : vector<1x4xf32>
    %39 = vector.broadcast %7 : f32 to vector<1x4xf32>
    %40 = arith.addf %38, %39 : vector<1x4xf32>
    %c9 = arith.constant 9 : index
    %41 = memref.load %arg1[%c9] : memref<25xf32, #tpu.memory_space<smem>>
    %42 = vector.broadcast %41 : f32 to vector<1x4xf32>
    %43 = arith.mulf %42, %40 : vector<1x4xf32>
    %44 = arith.addf %22, %43 : vector<1x4xf32>
    %45 = vector.extract_strided_slice %13 {offsets = [1, 0], sizes = [1, 4], strides = [1, 1]} : vector<16x4xf32> to vector<1x4xf32>
    %46 = vector.broadcast %45 : vector<1x4xf32> to vector<16x4xf32>
    %47 = arith.mulf %46, %17 : vector<16x4xf32>
    %cst_5 = arith.constant dense<0xFF800000> : vector<4xf32>
    %48 = vector.multi_reduction <maximumf>, %47, %cst_5 [0] : vector<16x4xf32> to vector<4xf32>
    %49 = vector.shape_cast %48 : vector<4xf32> to vector<1x4xf32>
    %50 = vector.broadcast %49 : vector<1x4xf32> to vector<16x4xf32>
    %51 = arith.subf %47, %50 : vector<16x4xf32>
    %52 = math.exp %51 : vector<16x4xf32>
    %cst_6 = arith.constant dense<0.000000e+00> : vector<4xf32>
    %53 = vector.multi_reduction <add>, %52, %cst_6 [0] : vector<16x4xf32> to vector<4xf32>
    %54 = vector.shape_cast %53 : vector<4xf32> to vector<1x4xf32>
    %55 = arith.mulf %52, %21 : vector<16x4xf32>
    %cst_7 = arith.constant dense<0.000000e+00> : vector<4xf32>
    %56 = vector.multi_reduction <add>, %55, %cst_7 [0] : vector<16x4xf32> to vector<4xf32>
    %57 = vector.shape_cast %56 : vector<4xf32> to vector<1x4xf32>
    %58 = arith.divf %57, %54 : vector<1x4xf32>
    %59 = vector.broadcast %6 : f32 to vector<1x4xf32>
    %60 = arith.mulf %59, %58 : vector<1x4xf32>
    %61 = vector.broadcast %7 : f32 to vector<1x4xf32>
    %62 = arith.addf %60, %61 : vector<1x4xf32>
    %c10 = arith.constant 10 : index
    %63 = memref.load %arg1[%c10] : memref<25xf32, #tpu.memory_space<smem>>
    %64 = vector.broadcast %63 : f32 to vector<1x4xf32>
    %65 = arith.mulf %64, %62 : vector<1x4xf32>
    %66 = arith.addf %44, %65 : vector<1x4xf32>
    %67 = vector.extract_strided_slice %13 {offsets = [2, 0], sizes = [1, 4], strides = [1, 1]} : vector<16x4xf32> to vector<1x4xf32>
    %68 = vector.broadcast %67 : vector<1x4xf32> to vector<16x4xf32>
    %69 = arith.mulf %68, %17 : vector<16x4xf32>
    %cst_8 = arith.constant dense<0xFF800000> : vector<4xf32>
    %70 = vector.multi_reduction <maximumf>, %69, %cst_8 [0] : vector<16x4xf32> to vector<4xf32>
    %71 = vector.shape_cast %70 : vector<4xf32> to vector<1x4xf32>
    %72 = vector.broadcast %71 : vector<1x4xf32> to vector<16x4xf32>
    %73 = arith.subf %69, %72 : vector<16x4xf32>
    %74 = math.exp %73 : vector<16x4xf32>
    %cst_9 = arith.constant dense<0.000000e+00> : vector<4xf32>
    %75 = vector.multi_reduction <add>, %74, %cst_9 [0] : vector<16x4xf32> to vector<4xf32>
    %76 = vector.shape_cast %75 : vector<4xf32> to vector<1x4xf32>
    %77 = arith.mulf %74, %21 : vector<16x4xf32>
    %cst_10 = arith.constant dense<0.000000e+00> : vector<4xf32>
    %78 = vector.multi_reduction <add>, %77, %cst_10 [0] : vector<16x4xf32> to vector<4xf32>
    %79 = vector.shape_cast %78 : vector<4xf32> to vector<1x4xf32>
    %80 = arith.divf %79, %76 : vector<1x4xf32>
    %81 = vector.broadcast %6 : f32 to vector<1x4xf32>
    %82 = arith.mulf %81, %80 : vector<1x4xf32>
    %83 = vector.broadcast %7 : f32 to vector<1x4xf32>
    %84 = arith.addf %82, %83 : vector<1x4xf32>
    %c11 = arith.constant 11 : index
    %85 = memref.load %arg1[%c11] : memref<25xf32, #tpu.memory_space<smem>>
    %86 = vector.broadcast %85 : f32 to vector<1x4xf32>
    %87 = arith.mulf %86, %84 : vector<1x4xf32>
    %88 = arith.addf %66, %87 : vector<1x4xf32>
    %89 = vector.extract_strided_slice %13 {offsets = [3, 0], sizes = [1, 4], strides = [1, 1]} : vector<16x4xf32> to vector<1x4xf32>
    %90 = vector.broadcast %89 : vector<1x4xf32> to vector<16x4xf32>
    %91 = arith.mulf %90, %17 : vector<16x4xf32>
    %cst_11 = arith.constant dense<0xFF800000> : vector<4xf32>
    %92 = vector.multi_reduction <maximumf>, %91, %cst_11 [0] : vector<16x4xf32> to vector<4xf32>
    %93 = vector.shape_cast %92 : vector<4xf32> to vector<1x4xf32>
    %94 = vector.broadcast %93 : vector<1x4xf32> to vector<16x4xf32>
    %95 = arith.subf %91, %94 : vector<16x4xf32>
    %96 = math.exp %95 : vector<16x4xf32>
    %cst_12 = arith.constant dense<0.000000e+00> : vector<4xf32>
    %97 = vector.multi_reduction <add>, %96, %cst_12 [0] : vector<16x4xf32> to vector<4xf32>
    %98 = vector.shape_cast %97 : vector<4xf32> to vector<1x4xf32>
    %99 = arith.mulf %96, %21 : vector<16x4xf32>
    %cst_13 = arith.constant dense<0.000000e+00> : vector<4xf32>
    %100 = vector.multi_reduction <add>, %99, %cst_13 [0] : vector<16x4xf32> to vector<4xf32>
    %101 = vector.shape_cast %100 : vector<4xf32> to vector<1x4xf32>
    %102 = arith.divf %101, %98 : vector<1x4xf32>
    %103 = vector.broadcast %6 : f32 to vector<1x4xf32>
    %104 = arith.mulf %103, %102 : vector<1x4xf32>
    %105 = vector.broadcast %7 : f32 to vector<1x4xf32>
    %106 = arith.addf %104, %105 : vector<1x4xf32>
    %c12 = arith.constant 12 : index
    %107 = memref.load %arg1[%c12] : memref<25xf32, #tpu.memory_space<smem>>
    %108 = vector.broadcast %107 : f32 to vector<1x4xf32>
    %109 = arith.mulf %108, %106 : vector<1x4xf32>
    %110 = arith.addf %88, %109 : vector<1x4xf32>
    %111 = vector.extract_strided_slice %13 {offsets = [4, 0], sizes = [1, 4], strides = [1, 1]} : vector<16x4xf32> to vector<1x4xf32>
    %112 = vector.broadcast %111 : vector<1x4xf32> to vector<16x4xf32>
    %113 = arith.mulf %112, %17 : vector<16x4xf32>
    %cst_14 = arith.constant dense<0xFF800000> : vector<4xf32>
    %114 = vector.multi_reduction <maximumf>, %113, %cst_14 [0] : vector<16x4xf32> to vector<4xf32>
    %115 = vector.shape_cast %114 : vector<4xf32> to vector<1x4xf32>
    %116 = vector.broadcast %115 : vector<1x4xf32> to vector<16x4xf32>
    %117 = arith.subf %113, %116 : vector<16x4xf32>
    %118 = math.exp %117 : vector<16x4xf32>
    %cst_15 = arith.constant dense<0.000000e+00> : vector<4xf32>
    %119 = vector.multi_reduction <add>, %118, %cst_15 [0] : vector<16x4xf32> to vector<4xf32>
    %120 = vector.shape_cast %119 : vector<4xf32> to vector<1x4xf32>
    %121 = arith.mulf %118, %21 : vector<16x4xf32>
    %cst_16 = arith.constant dense<0.000000e+00> : vector<4xf32>
    %122 = vector.multi_reduction <add>, %121, %cst_16 [0] : vector<16x4xf32> to vector<4xf32>
    %123 = vector.shape_cast %122 : vector<4xf32> to vector<1x4xf32>
    %124 = arith.divf %123, %120 : vector<1x4xf32>
    %125 = vector.broadcast %6 : f32 to vector<1x4xf32>
    %126 = arith.mulf %125, %124 : vector<1x4xf32>
    %127 = vector.broadcast %7 : f32 to vector<1x4xf32>
    %128 = arith.addf %126, %127 : vector<1x4xf32>
    %c13 = arith.constant 13 : index
    %129 = memref.load %arg1[%c13] : memref<25xf32, #tpu.memory_space<smem>>
    %130 = vector.broadcast %129 : f32 to vector<1x4xf32>
    %131 = arith.mulf %130, %128 : vector<1x4xf32>
    %132 = arith.addf %110, %131 : vector<1x4xf32>
    %133 = vector.extract_strided_slice %13 {offsets = [5, 0], sizes = [1, 4], strides = [1, 1]} : vector<16x4xf32> to vector<1x4xf32>
    %134 = vector.broadcast %133 : vector<1x4xf32> to vector<16x4xf32>
    %135 = arith.mulf %134, %17 : vector<16x4xf32>
    %cst_17 = arith.constant dense<0xFF800000> : vector<4xf32>
    %136 = vector.multi_reduction <maximumf>, %135, %cst_17 [0] : vector<16x4xf32> to vector<4xf32>
    %137 = vector.shape_cast %136 : vector<4xf32> to vector<1x4xf32>
    %138 = vector.broadcast %137 : vector<1x4xf32> to vector<16x4xf32>
    %139 = arith.subf %135, %138 : vector<16x4xf32>
    %140 = math.exp %139 : vector<16x4xf32>
    %cst_18 = arith.constant dense<0.000000e+00> : vector<4xf32>
    %141 = vector.multi_reduction <add>, %140, %cst_18 [0] : vector<16x4xf32> to vector<4xf32>
    %142 = vector.shape_cast %141 : vector<4xf32> to vector<1x4xf32>
    %143 = arith.mulf %140, %21 : vector<16x4xf32>
    %cst_19 = arith.constant dense<0.000000e+00> : vector<4xf32>
    %144 = vector.multi_reduction <add>, %143, %cst_19 [0] : vector<16x4xf32> to vector<4xf32>
    %145 = vector.shape_cast %144 : vector<4xf32> to vector<1x4xf32>
    %146 = arith.divf %145, %142 : vector<1x4xf32>
    %147 = vector.broadcast %6 : f32 to vector<1x4xf32>
    %148 = arith.mulf %147, %146 : vector<1x4xf32>
    %149 = vector.broadcast %7 : f32 to vector<1x4xf32>
    %150 = arith.addf %148, %149 : vector<1x4xf32>
    %c14 = arith.constant 14 : index
    %151 = memref.load %arg1[%c14] : memref<25xf32, #tpu.memory_space<smem>>
    %152 = vector.broadcast %151 : f32 to vector<1x4xf32>
    %153 = arith.mulf %152, %150 : vector<1x4xf32>
    %154 = arith.addf %132, %153 : vector<1x4xf32>
    %155 = vector.extract_strided_slice %13 {offsets = [6, 0], sizes = [1, 4], strides = [1, 1]} : vector<16x4xf32> to vector<1x4xf32>
    %156 = vector.broadcast %155 : vector<1x4xf32> to vector<16x4xf32>
    %157 = arith.mulf %156, %17 : vector<16x4xf32>
    %cst_20 = arith.constant dense<0xFF800000> : vector<4xf32>
    %158 = vector.multi_reduction <maximumf>, %157, %cst_20 [0] : vector<16x4xf32> to vector<4xf32>
    %159 = vector.shape_cast %158 : vector<4xf32> to vector<1x4xf32>
    %160 = vector.broadcast %159 : vector<1x4xf32> to vector<16x4xf32>
    %161 = arith.subf %157, %160 : vector<16x4xf32>
    %162 = math.exp %161 : vector<16x4xf32>
    %cst_21 = arith.constant dense<0.000000e+00> : vector<4xf32>
    %163 = vector.multi_reduction <add>, %162, %cst_21 [0] : vector<16x4xf32> to vector<4xf32>
    %164 = vector.shape_cast %163 : vector<4xf32> to vector<1x4xf32>
    %165 = arith.mulf %162, %21 : vector<16x4xf32>
    %cst_22 = arith.constant dense<0.000000e+00> : vector<4xf32>
    %166 = vector.multi_reduction <add>, %165, %cst_22 [0] : vector<16x4xf32> to vector<4xf32>
    %167 = vector.shape_cast %166 : vector<4xf32> to vector<1x4xf32>
    %168 = arith.divf %167, %164 : vector<1x4xf32>
    %169 = vector.broadcast %6 : f32 to vector<1x4xf32>
    %170 = arith.mulf %169, %168 : vector<1x4xf32>
    %171 = vector.broadcast %7 : f32 to vector<1x4xf32>
    %172 = arith.addf %170, %171 : vector<1x4xf32>
    %c15 = arith.constant 15 : index
    %173 = memref.load %arg1[%c15] : memref<25xf32, #tpu.memory_space<smem>>
    %174 = vector.broadcast %173 : f32 to vector<1x4xf32>
    %175 = arith.mulf %174, %172 : vector<1x4xf32>
    %176 = arith.addf %154, %175 : vector<1x4xf32>
    %177 = vector.extract_strided_slice %13 {offsets = [7, 0], sizes = [1, 4], strides = [1, 1]} : vector<16x4xf32> to vector<1x4xf32>
    %178 = vector.broadcast %177 : vector<1x4xf32> to vector<16x4xf32>
    %179 = arith.mulf %178, %17 : vector<16x4xf32>
    %cst_23 = arith.constant dense<0xFF800000> : vector<4xf32>
    %180 = vector.multi_reduction <maximumf>, %179, %cst_23 [0] : vector<16x4xf32> to vector<4xf32>
    %181 = vector.shape_cast %180 : vector<4xf32> to vector<1x4xf32>
    %182 = vector.broadcast %181 : vector<1x4xf32> to vector<16x4xf32>
    %183 = arith.subf %179, %182 : vector<16x4xf32>
    %184 = math.exp %183 : vector<16x4xf32>
    %cst_24 = arith.constant dense<0.000000e+00> : vector<4xf32>
    %185 = vector.multi_reduction <add>, %184, %cst_24 [0] : vector<16x4xf32> to vector<4xf32>
    %186 = vector.shape_cast %185 : vector<4xf32> to vector<1x4xf32>
    %187 = arith.mulf %184, %21 : vector<16x4xf32>
    %cst_25 = arith.constant dense<0.000000e+00> : vector<4xf32>
    %188 = vector.multi_reduction <add>, %187, %cst_25 [0] : vector<16x4xf32> to vector<4xf32>
    %189 = vector.shape_cast %188 : vector<4xf32> to vector<1x4xf32>
    %190 = arith.divf %189, %186 : vector<1x4xf32>
    %191 = vector.broadcast %6 : f32 to vector<1x4xf32>
    %192 = arith.mulf %191, %190 : vector<1x4xf32>
    %193 = vector.broadcast %7 : f32 to vector<1x4xf32>
    %194 = arith.addf %192, %193 : vector<1x4xf32>
    %c16 = arith.constant 16 : index
    %195 = memref.load %arg1[%c16] : memref<25xf32, #tpu.memory_space<smem>>
    %196 = vector.broadcast %195 : f32 to vector<1x4xf32>
    %197 = arith.mulf %196, %194 : vector<1x4xf32>
    %198 = arith.addf %176, %197 : vector<1x4xf32>
    %199 = vector.extract_strided_slice %13 {offsets = [8, 0], sizes = [1, 4], strides = [1, 1]} : vector<16x4xf32> to vector<1x4xf32>
    %200 = vector.broadcast %199 : vector<1x4xf32> to vector<16x4xf32>
    %201 = arith.mulf %200, %17 : vector<16x4xf32>
    %cst_26 = arith.constant dense<0xFF800000> : vector<4xf32>
    %202 = vector.multi_reduction <maximumf>, %201, %cst_26 [0] : vector<16x4xf32> to vector<4xf32>
    %203 = vector.shape_cast %202 : vector<4xf32> to vector<1x4xf32>
    %204 = vector.broadcast %203 : vector<1x4xf32> to vector<16x4xf32>
    %205 = arith.subf %201, %204 : vector<16x4xf32>
    %206 = math.exp %205 : vector<16x4xf32>
    %cst_27 = arith.constant dense<0.000000e+00> : vector<4xf32>
    %207 = vector.multi_reduction <add>, %206, %cst_27 [0] : vector<16x4xf32> to vector<4xf32>
    %208 = vector.shape_cast %207 : vector<4xf32> to vector<1x4xf32>
    %209 = arith.mulf %206, %21 : vector<16x4xf32>
    %cst_28 = arith.constant dense<0.000000e+00> : vector<4xf32>
    %210 = vector.multi_reduction <add>, %209, %cst_28 [0] : vector<16x4xf32> to vector<4xf32>
    %211 = vector.shape_cast %210 : vector<4xf32> to vector<1x4xf32>
    %212 = arith.divf %211, %208 : vector<1x4xf32>
    %213 = vector.broadcast %6 : f32 to vector<1x4xf32>
    %214 = arith.mulf %213, %212 : vector<1x4xf32>
    %215 = vector.broadcast %7 : f32 to vector<1x4xf32>
    %216 = arith.addf %214, %215 : vector<1x4xf32>
    %c17 = arith.constant 17 : index
    %217 = memref.load %arg1[%c17] : memref<25xf32, #tpu.memory_space<smem>>
    %218 = vector.broadcast %217 : f32 to vector<1x4xf32>
    %219 = arith.mulf %218, %216 : vector<1x4xf32>
    %220 = arith.addf %198, %219 : vector<1x4xf32>
    %221 = vector.extract_strided_slice %13 {offsets = [9, 0], sizes = [1, 4], strides = [1, 1]} : vector<16x4xf32> to vector<1x4xf32>
    %222 = vector.broadcast %221 : vector<1x4xf32> to vector<16x4xf32>
    %223 = arith.mulf %222, %17 : vector<16x4xf32>
    %cst_29 = arith.constant dense<0xFF800000> : vector<4xf32>
    %224 = vector.multi_reduction <maximumf>, %223, %cst_29 [0] : vector<16x4xf32> to vector<4xf32>
    %225 = vector.shape_cast %224 : vector<4xf32> to vector<1x4xf32>
    %226 = vector.broadcast %225 : vector<1x4xf32> to vector<16x4xf32>
    %227 = arith.subf %223, %226 : vector<16x4xf32>
    %228 = math.exp %227 : vector<16x4xf32>
    %cst_30 = arith.constant dense<0.000000e+00> : vector<4xf32>
    %229 = vector.multi_reduction <add>, %228, %cst_30 [0] : vector<16x4xf32> to vector<4xf32>
    %230 = vector.shape_cast %229 : vector<4xf32> to vector<1x4xf32>
    %231 = arith.mulf %228, %21 : vector<16x4xf32>
    %cst_31 = arith.constant dense<0.000000e+00> : vector<4xf32>
    %232 = vector.multi_reduction <add>, %231, %cst_31 [0] : vector<16x4xf32> to vector<4xf32>
    %233 = vector.shape_cast %232 : vector<4xf32> to vector<1x4xf32>
    %234 = arith.divf %233, %230 : vector<1x4xf32>
    %235 = vector.broadcast %6 : f32 to vector<1x4xf32>
    %236 = arith.mulf %235, %234 : vector<1x4xf32>
    %237 = vector.broadcast %7 : f32 to vector<1x4xf32>
    %238 = arith.addf %236, %237 : vector<1x4xf32>
    %c18 = arith.constant 18 : index
    %239 = memref.load %arg1[%c18] : memref<25xf32, #tpu.memory_space<smem>>
    %240 = vector.broadcast %239 : f32 to vector<1x4xf32>
    %241 = arith.mulf %240, %238 : vector<1x4xf32>
    %242 = arith.addf %220, %241 : vector<1x4xf32>
    %243 = vector.extract_strided_slice %13 {offsets = [10, 0], sizes = [1, 4], strides = [1, 1]} : vector<16x4xf32> to vector<1x4xf32>
    %244 = vector.broadcast %243 : vector<1x4xf32> to vector<16x4xf32>
    %245 = arith.mulf %244, %17 : vector<16x4xf32>
    %cst_32 = arith.constant dense<0xFF800000> : vector<4xf32>
    %246 = vector.multi_reduction <maximumf>, %245, %cst_32 [0] : vector<16x4xf32> to vector<4xf32>
    %247 = vector.shape_cast %246 : vector<4xf32> to vector<1x4xf32>
    %248 = vector.broadcast %247 : vector<1x4xf32> to vector<16x4xf32>
    %249 = arith.subf %245, %248 : vector<16x4xf32>
    %250 = math.exp %249 : vector<16x4xf32>
    %cst_33 = arith.constant dense<0.000000e+00> : vector<4xf32>
    %251 = vector.multi_reduction <add>, %250, %cst_33 [0] : vector<16x4xf32> to vector<4xf32>
    %252 = vector.shape_cast %251 : vector<4xf32> to vector<1x4xf32>
    %253 = arith.mulf %250, %21 : vector<16x4xf32>
    %cst_34 = arith.constant dense<0.000000e+00> : vector<4xf32>
    %254 = vector.multi_reduction <add>, %253, %cst_34 [0] : vector<16x4xf32> to vector<4xf32>
    %255 = vector.shape_cast %254 : vector<4xf32> to vector<1x4xf32>
    %256 = arith.divf %255, %252 : vector<1x4xf32>
    %257 = vector.broadcast %6 : f32 to vector<1x4xf32>
    %258 = arith.mulf %257, %256 : vector<1x4xf32>
    %259 = vector.broadcast %7 : f32 to vector<1x4xf32>
    %260 = arith.addf %258, %259 : vector<1x4xf32>
    %c19 = arith.constant 19 : index
    %261 = memref.load %arg1[%c19] : memref<25xf32, #tpu.memory_space<smem>>
    %262 = vector.broadcast %261 : f32 to vector<1x4xf32>
    %263 = arith.mulf %262, %260 : vector<1x4xf32>
    %264 = arith.addf %242, %263 : vector<1x4xf32>
    %265 = vector.extract_strided_slice %13 {offsets = [11, 0], sizes = [1, 4], strides = [1, 1]} : vector<16x4xf32> to vector<1x4xf32>
    %266 = vector.broadcast %265 : vector<1x4xf32> to vector<16x4xf32>
    %267 = arith.mulf %266, %17 : vector<16x4xf32>
    %cst_35 = arith.constant dense<0xFF800000> : vector<4xf32>
    %268 = vector.multi_reduction <maximumf>, %267, %cst_35 [0] : vector<16x4xf32> to vector<4xf32>
    %269 = vector.shape_cast %268 : vector<4xf32> to vector<1x4xf32>
    %270 = vector.broadcast %269 : vector<1x4xf32> to vector<16x4xf32>
    %271 = arith.subf %267, %270 : vector<16x4xf32>
    %272 = math.exp %271 : vector<16x4xf32>
    %cst_36 = arith.constant dense<0.000000e+00> : vector<4xf32>
    %273 = vector.multi_reduction <add>, %272, %cst_36 [0] : vector<16x4xf32> to vector<4xf32>
    %274 = vector.shape_cast %273 : vector<4xf32> to vector<1x4xf32>
    %275 = arith.mulf %272, %21 : vector<16x4xf32>
    %cst_37 = arith.constant dense<0.000000e+00> : vector<4xf32>
    %276 = vector.multi_reduction <add>, %275, %cst_37 [0] : vector<16x4xf32> to vector<4xf32>
    %277 = vector.shape_cast %276 : vector<4xf32> to vector<1x4xf32>
    %278 = arith.divf %277, %274 : vector<1x4xf32>
    %279 = vector.broadcast %6 : f32 to vector<1x4xf32>
    %280 = arith.mulf %279, %278 : vector<1x4xf32>
    %281 = vector.broadcast %7 : f32 to vector<1x4xf32>
    %282 = arith.addf %280, %281 : vector<1x4xf32>
    %c20 = arith.constant 20 : index
    %283 = memref.load %arg1[%c20] : memref<25xf32, #tpu.memory_space<smem>>
    %284 = vector.broadcast %283 : f32 to vector<1x4xf32>
    %285 = arith.mulf %284, %282 : vector<1x4xf32>
    %286 = arith.addf %264, %285 : vector<1x4xf32>
    %287 = vector.extract_strided_slice %13 {offsets = [12, 0], sizes = [1, 4], strides = [1, 1]} : vector<16x4xf32> to vector<1x4xf32>
    %288 = vector.broadcast %287 : vector<1x4xf32> to vector<16x4xf32>
    %289 = arith.mulf %288, %17 : vector<16x4xf32>
    %cst_38 = arith.constant dense<0xFF800000> : vector<4xf32>
    %290 = vector.multi_reduction <maximumf>, %289, %cst_38 [0] : vector<16x4xf32> to vector<4xf32>
    %291 = vector.shape_cast %290 : vector<4xf32> to vector<1x4xf32>
    %292 = vector.broadcast %291 : vector<1x4xf32> to vector<16x4xf32>
    %293 = arith.subf %289, %292 : vector<16x4xf32>
    %294 = math.exp %293 : vector<16x4xf32>
    %cst_39 = arith.constant dense<0.000000e+00> : vector<4xf32>
    %295 = vector.multi_reduction <add>, %294, %cst_39 [0] : vector<16x4xf32> to vector<4xf32>
    %296 = vector.shape_cast %295 : vector<4xf32> to vector<1x4xf32>
    %297 = arith.mulf %294, %21 : vector<16x4xf32>
    %cst_40 = arith.constant dense<0.000000e+00> : vector<4xf32>
    %298 = vector.multi_reduction <add>, %297, %cst_40 [0] : vector<16x4xf32> to vector<4xf32>
    %299 = vector.shape_cast %298 : vector<4xf32> to vector<1x4xf32>
    %300 = arith.divf %299, %296 : vector<1x4xf32>
    %301 = vector.broadcast %6 : f32 to vector<1x4xf32>
    %302 = arith.mulf %301, %300 : vector<1x4xf32>
    %303 = vector.broadcast %7 : f32 to vector<1x4xf32>
    %304 = arith.addf %302, %303 : vector<1x4xf32>
    %c21 = arith.constant 21 : index
    %305 = memref.load %arg1[%c21] : memref<25xf32, #tpu.memory_space<smem>>
    %306 = vector.broadcast %305 : f32 to vector<1x4xf32>
    %307 = arith.mulf %306, %304 : vector<1x4xf32>
    %308 = arith.addf %286, %307 : vector<1x4xf32>
    %309 = vector.extract_strided_slice %13 {offsets = [13, 0], sizes = [1, 4], strides = [1, 1]} : vector<16x4xf32> to vector<1x4xf32>
    %310 = vector.broadcast %309 : vector<1x4xf32> to vector<16x4xf32>
    %311 = arith.mulf %310, %17 : vector<16x4xf32>
    %cst_41 = arith.constant dense<0xFF800000> : vector<4xf32>
    %312 = vector.multi_reduction <maximumf>, %311, %cst_41 [0] : vector<16x4xf32> to vector<4xf32>
    %313 = vector.shape_cast %312 : vector<4xf32> to vector<1x4xf32>
    %314 = vector.broadcast %313 : vector<1x4xf32> to vector<16x4xf32>
    %315 = arith.subf %311, %314 : vector<16x4xf32>
    %316 = math.exp %315 : vector<16x4xf32>
    %cst_42 = arith.constant dense<0.000000e+00> : vector<4xf32>
    %317 = vector.multi_reduction <add>, %316, %cst_42 [0] : vector<16x4xf32> to vector<4xf32>
    %318 = vector.shape_cast %317 : vector<4xf32> to vector<1x4xf32>
    %319 = arith.mulf %316, %21 : vector<16x4xf32>
    %cst_43 = arith.constant dense<0.000000e+00> : vector<4xf32>
    %320 = vector.multi_reduction <add>, %319, %cst_43 [0] : vector<16x4xf32> to vector<4xf32>
    %321 = vector.shape_cast %320 : vector<4xf32> to vector<1x4xf32>
    %322 = arith.divf %321, %318 : vector<1x4xf32>
    %323 = vector.broadcast %6 : f32 to vector<1x4xf32>
    %324 = arith.mulf %323, %322 : vector<1x4xf32>
    %325 = vector.broadcast %7 : f32 to vector<1x4xf32>
    %326 = arith.addf %324, %325 : vector<1x4xf32>
    %c22 = arith.constant 22 : index
    %327 = memref.load %arg1[%c22] : memref<25xf32, #tpu.memory_space<smem>>
    %328 = vector.broadcast %327 : f32 to vector<1x4xf32>
    %329 = arith.mulf %328, %326 : vector<1x4xf32>
    %330 = arith.addf %308, %329 : vector<1x4xf32>
    %331 = vector.extract_strided_slice %13 {offsets = [14, 0], sizes = [1, 4], strides = [1, 1]} : vector<16x4xf32> to vector<1x4xf32>
    %332 = vector.broadcast %331 : vector<1x4xf32> to vector<16x4xf32>
    %333 = arith.mulf %332, %17 : vector<16x4xf32>
    %cst_44 = arith.constant dense<0xFF800000> : vector<4xf32>
    %334 = vector.multi_reduction <maximumf>, %333, %cst_44 [0] : vector<16x4xf32> to vector<4xf32>
    %335 = vector.shape_cast %334 : vector<4xf32> to vector<1x4xf32>
    %336 = vector.broadcast %335 : vector<1x4xf32> to vector<16x4xf32>
    %337 = arith.subf %333, %336 : vector<16x4xf32>
    %338 = math.exp %337 : vector<16x4xf32>
    %cst_45 = arith.constant dense<0.000000e+00> : vector<4xf32>
    %339 = vector.multi_reduction <add>, %338, %cst_45 [0] : vector<16x4xf32> to vector<4xf32>
    %340 = vector.shape_cast %339 : vector<4xf32> to vector<1x4xf32>
    %341 = arith.mulf %338, %21 : vector<16x4xf32>
    %cst_46 = arith.constant dense<0.000000e+00> : vector<4xf32>
    %342 = vector.multi_reduction <add>, %341, %cst_46 [0] : vector<16x4xf32> to vector<4xf32>
    %343 = vector.shape_cast %342 : vector<4xf32> to vector<1x4xf32>
    %344 = arith.divf %343, %340 : vector<1x4xf32>
    %345 = vector.broadcast %6 : f32 to vector<1x4xf32>
    %346 = arith.mulf %345, %344 : vector<1x4xf32>
    %347 = vector.broadcast %7 : f32 to vector<1x4xf32>
    %348 = arith.addf %346, %347 : vector<1x4xf32>
    %c23 = arith.constant 23 : index
    %349 = memref.load %arg1[%c23] : memref<25xf32, #tpu.memory_space<smem>>
    %350 = vector.broadcast %349 : f32 to vector<1x4xf32>
    %351 = arith.mulf %350, %348 : vector<1x4xf32>
    %352 = arith.addf %330, %351 : vector<1x4xf32>
    %353 = vector.extract_strided_slice %13 {offsets = [15, 0], sizes = [1, 4], strides = [1, 1]} : vector<16x4xf32> to vector<1x4xf32>
    %354 = vector.broadcast %353 : vector<1x4xf32> to vector<16x4xf32>
    %355 = arith.mulf %354, %17 : vector<16x4xf32>
    %cst_47 = arith.constant dense<0xFF800000> : vector<4xf32>
    %356 = vector.multi_reduction <maximumf>, %355, %cst_47 [0] : vector<16x4xf32> to vector<4xf32>
    %357 = vector.shape_cast %356 : vector<4xf32> to vector<1x4xf32>
    %358 = vector.broadcast %357 : vector<1x4xf32> to vector<16x4xf32>
    %359 = arith.subf %355, %358 : vector<16x4xf32>
    %360 = math.exp %359 : vector<16x4xf32>
    %cst_48 = arith.constant dense<0.000000e+00> : vector<4xf32>
    %361 = vector.multi_reduction <add>, %360, %cst_48 [0] : vector<16x4xf32> to vector<4xf32>
    %362 = vector.shape_cast %361 : vector<4xf32> to vector<1x4xf32>
    %363 = arith.mulf %360, %21 : vector<16x4xf32>
    %cst_49 = arith.constant dense<0.000000e+00> : vector<4xf32>
    %364 = vector.multi_reduction <add>, %363, %cst_49 [0] : vector<16x4xf32> to vector<4xf32>
    %365 = vector.shape_cast %364 : vector<4xf32> to vector<1x4xf32>
    %366 = arith.divf %365, %362 : vector<1x4xf32>
    %367 = vector.broadcast %6 : f32 to vector<1x4xf32>
    %368 = arith.mulf %367, %366 : vector<1x4xf32>
    %369 = vector.broadcast %7 : f32 to vector<1x4xf32>
    %370 = arith.addf %368, %369 : vector<1x4xf32>
    %c24 = arith.constant 24 : index
    %371 = memref.load %arg1[%c24] : memref<25xf32, #tpu.memory_space<smem>>
    %372 = vector.broadcast %371 : f32 to vector<1x4xf32>
    %373 = arith.mulf %372, %370 : vector<1x4xf32>
    %374 = arith.addf %352, %373 : vector<1x4xf32>
    %375 = vector.broadcast %8 : f32 to vector<1x4xf32>
    %376 = arith.addf %374, %375 : vector<1x4xf32>
    %cst_50 = arith.constant 0.000000e+00 : f32
    %377 = vector.broadcast %cst_50 : f32 to vector<1x4xf32>
    %378 = arith.subf %377, %376 : vector<1x4xf32>
    %379 = math.exp %378 : vector<1x4xf32>
    %cst_51 = arith.constant 1.000000e+00 : f32
    %380 = vector.broadcast %cst_51 : f32 to vector<1x4xf32>
    %381 = arith.addf %380, %379 : vector<1x4xf32>
    %cst_52 = arith.constant 1.000000e+00 : f32
    %382 = vector.broadcast %cst_52 : f32 to vector<1x4xf32>
    %383 = arith.divf %382, %381 : vector<1x4xf32>
    %c0_53 = arith.constant 0 : index
    %c0_54 = arith.constant 0 : index
    %384 = vector.load %arg3[%c0_53, %c0_54] : memref<1x4xf32, #tpu.memory_space<vmem>>, vector<1x4xf32>
    tpu.vector_store %arg3[%c0_53, %c0_54], %383 {strides = array<i32>} : memref<1x4xf32, #tpu.memory_space<vmem>>, vector<1x4xf32>,
    return
  }
  func.func @transform_0(%arg0: i32) -> i32 {
    %c0_i32 = arith.constant 0 : i32
    %c0_i32_0 = arith.constant 0 : i32
    return %c0_i32 : i32
  }
  func.func @transform_1(%arg0: i32) -> (i32, i32) {
    %c0_i32 = arith.constant 0 : i32
    %c0_i32_0 = arith.constant 0 : i32
    return %c0_i32, %arg0 : i32, i32
  }
  func.func @transform_2(%arg0: i32) -> (i32, i32) {
    %c0_i32 = arith.constant 0 : i32
    %c0_i32_0 = arith.constant 0 : i32
    return %arg0, %c0_i32 : i32, i32
  }
}

</mosaic_0001>

<bundles_post_ra>
// kernel: tpu_custom_call.1
= control target key start
LH: loop header
LB: loop body
LE: loop exit
PB: predicated region body
PF: predicated region fallthrough
CT: control target
= control target key end

     0   :  { %7 = vsyncpa [#allocation4], 0  ;;  %s1569_s0 = inlined_call_operand.vmem [shape: f32[25], index: 0, kind: input, shape index: {}]   ;;  %s1570_s1 = inlined_call_operand.vmem [shape: f32[16,4], index: 1, kind: input, shape index: {}]   ;;  %s1571_s2 = inlined_call_operand.hbm [shape: f32[1,4], index: 2, kind: output, shape index: {}]  }
   0x1   :  { %8 = vsyncpa [#allocation3], 0  ;;  %s15_s11 = sshll.u32 %s1569_s0, 4  ;;  %s16_s11 = int_to_ptr.vmem [resolvable:$true] %s15_s11 }
   0x2   :  { %s992_s12 = scalar_lea.vmem %s16_s11, 16  ;;  %p997_p1 = scmp.lt.s32.totalorder %s16_s11, %s16_s11 }
   0x3   :  { %p993_p0 = scmp.ne.s32.totalorder %s16_s11, %s992_s12  ;;  %p998_p2 = scmp.lt.s32.totalorder %s992_s12, %s992_s12 }
   0x5   :  { %p999_p3 = por %p998_p2, %p997_p1 }
   0x7   :  { %p1000_p4 = pnand %p999_p3, %p993_p0 }
   0x9   :  { %1003 = shalt.err (!%p1000_p4)
}
   0xa   :  { %s1028_s13 = smov [#allocation2]  }
   0xb   :  { %18 = dma.vmem_to_smem %s16_s11, 16, %s1028_s13, [#allocation4]  }
   0xc   :  { %1024 = dma.done.wait [#allocation4], 16  }
   0xd   :  { %1025 = vsyncadd [#allocation4], 4294967280 }
   0xe   :  { %24 = sfence }
   0xf   :  { %s1048_s14 = sld [smem:[#allocation2]]  ;;  %v54_v0 = vlaneseq  ;;  %v1055_v1 = vld [vmem:[%s1570_s1] sm:$0xff]  ;;  %v1062_v3 = vld [vmem:[%s1570_s1 + $0x8] sm:$0xff]  ;;  %vm60_vm0 = vcmask 31744   ;;  %s1029_s13 = smov [#allocation5]   ;;  %vm849_vm1 = vcmask 24576  }
  0x10   :  { %s866_s15 = sld [smem:[#allocation2 + $0x1]] }
  0x11   :  { %s1050_s0 = sld [smem:[#allocation2 + $0x3]]  ;;  %v1057_v2 = vshrl.u32 %v54_v0, 7 }
  0x12   :  { %s869_s16 = sld [smem:[#allocation2 + $0x4]] }
  0x13   :  { %v56_v9 = vsub.s32 0, %v1057_v2  ;;  %v108_v11 = vsub.s32 1, %v1057_v2  ;;  %v157_v12 = vsub.s32 2, %v1057_v2  ;;  %v206_v15 = vsub.s32 3, %v1057_v2  ;;  %s867_s1 = sld [smem:[#allocation2 + $0x2]] }
  0x14   :  { %v255_v19 = vsub.s32 4, %v1057_v2  ;;  %v304_v28 = vsub.s32 5, %v1057_v2  ;;  %s870_s21 = sld [smem:[#allocation2 + $0x5]] }
  0x15   :  { %v36_v4 = vstv %s1048_s14  ;;  %s1186_s22 = sld [smem:[#allocation2 + $0x6]]  ;;  %s857_s14 = sshll.u32 %s1029_s13, 4  ;;  %s858_s14 = int_to_ptr.vmem [resolvable:$true] %s857_s14 }
  0x16   :  { %v37_v5 = vmul.f32 %v36_v4, %v1055_v1  ;;  %v42_v6 = vstv %s866_s15  ;;  %s1190_s23 = sld [smem:[#allocation2 + $0x7]]  ;;  %s1004_s15 = scalar_lea.vmem %s858_s14, 16 }
  0x17   :  { %v43_v7 = vmul.f32 %v42_v6, %v1055_v1  ;;  %v44_v8 = vmul.f32 %v42_v6, %v1062_v3  ;;  %v39_v10 = vstv %s1050_s0  ;;  %s1202_s24 = sld [smem:[#allocation2 + $0x9]]  ;;  %p1005_p5 = scmp.ne.s32.totalorder %s858_s14, %s1004_s15 }
  0x18   :  { %v1076_v13 = vadd.f32 %v39_v10, %v37_v5  ;;  %v45_v14 = vstv %s869_s16  ;;  %s1210_s25 = sld [smem:[#allocation2 + $0xa]]  ;;  %s1008_s0 = scalar_lea.vmem %s858_s14, 32 }
  0x19   :  { %v1079_v16 = vadd.f32 %v45_v14, %v43_v7  ;;  %v1081_v17 = vadd.f32 %v45_v14, %v44_v8  ;;  %s1220_s26 = sld [smem:[#allocation2 + $0xb]]  ;;  %p1009_p6 = scmp.lt.s32.totalorder %s858_s14, %s858_s14 }
  0x1a   :  { %v57_v18 = vrot.slane %v1076_v13, %v56_v9  ;;  %v109_v20 = vrot.slane %v1076_v13, %v108_v11  ;;  %v158_v21 = vrot.slane %v1076_v13, %v157_v12  ;;  %v207_v24 = vrot.slane %v1076_v13, %v206_v15  ;;  %s1230_s27 = sld [smem:[#allocation2 + $0xc]]  ;;  %p1010_p7 = scmp.lt.s32.totalorder %s1008_s0, %s1004_s15 }
  0x1b   :  { %v256_v32 = vrot.slane %v1076_v13, %v255_v19  ;;  %v305_v50 = vrot.slane %v1076_v13, %v304_v28  ;;  %s1316_s28 = sld [smem:[#allocation2 + $0xd]] }
  0x1c   :  { %v58_v22 = vmul.f32 %v57_v18, %v1079_v16  ;;  %v59_v23 = vmul.f32 %v57_v18, %v1081_v17  ;;  %v110_v25 = vmul.f32 %v109_v20, %v1079_v16  ;;  %v1100_v26 = vmul.f32 %v109_v20, %v1081_v17  ;;  %s1395_s29 = sld [smem:[#allocation2 + $0xe]]  ;;  %p1011_p8 = por %p1010_p7, %p1009_p6 }
  0x1d   :  { %v1103_v27 = vmul.f32 %v158_v21, %v1079_v16  ;;  %v1109_v31 = vmul.f32 %v158_v21, %v1081_v17  ;;  %v1122_v39 = vmul.f32 %v207_v24, %v1079_v16  ;;  %v1125_v42 = vmul.f32 %v207_v24, %v1081_v17  ;;  %s1402_s30 = sld [smem:[#allocation2 + $0xf]] }
  0x1e   :  { %v61_v29 = vsel %vm60_vm0, %v58_v22, -inf  ;;  %v62_v30 = vsel %vm60_vm0, %v59_v23, -inf  ;;  %v112_v34 = vsel %vm60_vm0, %v110_v25, -inf  ;;  %v113_v35 = vsel %vm60_vm0, %v1100_v26, -inf  ;;  %s1520_s3 = sld [smem:[#allocation2 + $0x10]]  ;;  %p1012_p9 = pnand %p1011_p8, %p1005_p5 }
  0x1f   :  { %v63_v33 = vmax.f32 %v61_v29, %v62_v30  ;;  %v161_v36 = vsel %vm60_vm0, %v1103_v27, -inf  ;;  %v114_v37 = vmax.f32 %v112_v34, %v113_v35  ;;  %v162_v38 = vsel %vm60_vm0, %v1109_v31, -inf  ;;  %s1522_s4 = sld [smem:[#allocation2 + $0x11]] }
  0x20   :  { %v163_v41 = vmax.f32 %v161_v36, %v162_v38  ;;  %v210_v44 = vsel %vm60_vm0, %v1122_v39, -inf  ;;  %v1130_v45 = vmul.f32 %v256_v32, %v1079_v16  ;;  %v1133_v46 = vmul.f32 %v256_v32, %v1081_v17  ;;  %s1534_s5 = sld [smem:[#allocation2 + $0x12]] }
  0x21   :  { %v64_v40 = vrot.slane %v63_v33, 4  ;;  %v115_v43 = vrot.slane %v114_v37, 4  ;;  %v211_v49 = vsel %vm60_vm0, %v1125_v42, -inf  ;;  %v1145_v62 = vmul.f32 %v305_v50, %v1079_v16  ;;  %s1540_s6 = sld [smem:[#allocation2 + $0x13]] }
  0x22   :  { %v164_v48 = vrot.slane %v163_v41, 4  ;;  %v212_v52 = vmax.f32 %v210_v44, %v211_v49  ;;  %v259_v53 = vsel %vm60_vm0, %v1130_v45, -inf  ;;  %v260_v54 = vsel %vm60_vm0, %v1133_v46, -inf  ;;  %s1551_s7 = sld [smem:[#allocation2 + $0x14]] }
  0x23   :  { %v65_v47 = vmax.f32 %v63_v33, %v64_v40  ;;  %v116_v51 = vmax.f32 %v114_v37, %v115_v43  ;;  %v261_v57 = vmax.f32 %v259_v53, %v260_v54  ;;  %v1148_v63 = vmul.f32 %v305_v50, %v1081_v17  ;;  %s886_s8 = sld [smem:[#allocation2 + $0x15]] }
  0x24   :  { %v165_v56 = vmax.f32 %v163_v41, %v164_v48  ;;  %v213_v59 = vrot.slane %v212_v52, 4  ;;  %v308_v20 = vsel %vm60_vm0, %v1145_v62, -inf  ;;  %v353_v50 = vsub.s32 6, %v1057_v2  ;;  %s887_s9 = sld [smem:[#allocation2 + $0x16]] }
  0x25   :  { %v66_v55 = vrot.slane %v65_v47, 2  ;;  %v117_v58 = vrot.slane %v116_v51, 2  ;;  %v262_v6 = vrot.slane %v261_v57, 4  ;;  %v309_v21 = vsel %vm60_vm0, %v1148_v63, -inf  ;;  %s888_s10 = sld [smem:[#allocation2 + $0x17]] }
  0x26   :  { %v166_v61 = vrot.slane %v165_v56, 2  ;;  %v214_v14 = vmax.f32 %v212_v52, %v213_v59  ;;  %v310_v36 = vmax.f32 %v308_v20, %v309_v21  ;;  %v354_v52 = vrot.slane %v1076_v13, %v353_v50  ;;  %s889_s11 = sld [smem:[#allocation2 + $0x18]] }
  0x27   :  { %v67_v60 = vmax.f32 %v65_v47, %v66_v55  ;;  %v118_v0 = vmax.f32 %v116_v51, %v117_v58  ;;  %v263_v32 = vmax.f32 %v261_v57, %v262_v6  ;;  %v48_v59 = vstv %s867_s1  ;;  %s873_s12 = sld [smem:[#allocation2 + $0x8]] }
  0x28   :  { %v167_v8 = vmax.f32 %v165_v56, %v166_v61  ;;  %v215_v35 = vrot.slane %v214_v14, 2  ;;  %v311_v48 = vrot.slane %v310_v36, 4  ;;  %v1162_v58 = vmul.f32 %v354_v52, %v1079_v16 }
  0x29   :  { %v68_v5 = vrot.slane %v67_v60, 1  ;;  %v119_v7 = vrot.slane %v118_v0, 1  ;;  %v264_v41 = vrot.slane %v263_v32, 2  ;;  %v51_v20 = vstv %s870_s21 }
  0x2a   :  { %v168_v34 = vrot.slane %v167_v8, 1  ;;  %v216_v47 = vmax.f32 %v214_v14, %v215_v35  ;;  %v312_v51 = vmax.f32 %v310_v36, %v311_v48  ;;  %v50_v14 = vmul.f32 %v48_v59, %v1062_v3 }
  0x2b   :  { %v69_v18 = vmax.f32 %v67_v60, %v68_v5  ;;  %v120_v24 = vmax.f32 %v118_v0, %v119_v7  ;;  %v357_v5 = vsel %vm60_vm0, %v1162_v58, -inf }
  0x2c   :  { %v169_v44 = vmax.f32 %v167_v8, %v168_v34  ;;  %v313_v56 = vrot.slane %v312_v51, 2  ;;  %v49_v8 = vmul.f32 %v48_v59, %v1055_v1  ;;  %v1178_v34 = vadd.f32 %v51_v20, %v50_v14 }
  0x2d   :  { %v70_v29 = vsub.f32 %v58_v22, %v69_v18  ;;  %v71_v30 = vsub.f32 %v59_v23, %v69_v18  ;;  %v121_v33 = vsub.f32 %v110_v25, %v120_v24  ;;  %v122_v38 = vsub.f32 %v1100_v26, %v120_v24 }
  0x2e   :  { %v265_v22 = vmax.f32 %v263_v32, %v264_v41  ;;  %v170_v23 = vsub.f32 %v1103_v27, %v169_v44  ;;  %v217_v25 = vrot.slane %v216_v47, 1  ;;  %v171_v26 = vsub.f32 %v1109_v31, %v169_v44 }
  0x2f   :  { %v72_v37 = vmul.f32 1.442695, %v70_v29  ;;  %v74_v40 = vmul.f32 1.442695, %v71_v30  ;;  %v123_v43 = vmul.f32 1.442695, %v121_v33  ;;  %v1165_v27 = vmul.f32 %v354_v52, %v1081_v17 }
  0x30   :  { %v125_v49 = vmul.f32 1.442695, %v122_v38  ;;  %v172_v53 = vmul.f32 1.442695, %v170_v23  ;;  %v218_v54 = vmax.f32 %v216_v47, %v217_v25  ;;  %v266_v55 = vrot.slane %v265_v22, 1 }
  0x31   :  { %892 = vpow2.f32 %v72_v37  ;;  %v174_v57 = vmul.f32 1.442695, %v171_v26  ;;  %v314_v61 = vmax.f32 %v312_v51, %v313_v56  ;;  %v358_v6 = vsel %vm60_vm0, %v1165_v27, -inf }
  0x32   :  { %894 = vpow2.f32 %v74_v40  ;;  %v219_v31 = vsub.f32 %v1122_v39, %v218_v54  ;;  %v267_v60 = vmax.f32 %v265_v22, %v266_v55  ;;  %v220_v0 = vsub.f32 %v1125_v42, %v218_v54 }
  0x33   :  { %896 = vpow2.f32 %v123_v43  ;;  %v315_v24 = vrot.slane %v314_v61, 1  ;;  %v359_v29 = vmax.f32 %v357_v5, %v358_v6  ;;  %v1176_v33 = vadd.f32 %v51_v20, %v49_v8 }
  0x34   :  { %898 = vpow2.f32 %v125_v49  ;;  %v221_v21 = vmul.f32 1.442695, %v219_v31  ;;  %v268_v39 = vsub.f32 %v1130_v45, %v267_v60  ;;  %v223_v42 = vmul.f32 1.442695, %v220_v0 }
  0x35   :  { %900 = vpow2.f32 %v172_v53  ;;  %v269_v36 = vsub.f32 %v1133_v46, %v267_v60  ;;  %v402_v37 = vsub.s32 7, %v1057_v2  ;;  %v316_v38 = vmax.f32 %v314_v61, %v315_v24 }
  0x36   :  { %902 = vpow2.f32 %v174_v57  ;;  %v270_v45 = vmul.f32 1.442695, %v268_v39  ;;  %v360_v40 = vrot.slane %v359_v29, 4  ;;  %v38_v46 = vmul.f32 %v36_v4, %v1062_v3 }
  0x37   :  { %904 = vpow2.f32 %v221_v21  ;;  %v272_v49 = vmul.f32 1.442695, %v269_v36  ;;  %v317_v23 = vsub.f32 %v1145_v62, %v316_v38  ;;  %v403_v25 = vrot.slane %v1076_v13, %v402_v37 }
  0x38   :  { %906 = vpow2.f32 %v223_v42  ;;  %v318_v52 = vsub.f32 %v1148_v63, %v316_v38  ;;  %v361_v53 = vmax.f32 %v359_v29, %v360_v40  ;;  %v1208_v56 = vadd.f32 %v39_v10, %v38_v46 }
  0x39   :  { %908 = vpow2.f32 %v270_v45  ;;  %v319_v63 = vmul.f32 1.442695, %v317_v23  ;;  %v1213_v57 = vmul.f32 %v403_v25, %v1079_v16  ;;  %v1216_v59 = vmul.f32 %v403_v25, %v1081_v17 }
  0x3a   :  { %910 = vpow2.f32 %v272_v49  ;;  %v321_v6 = vmul.f32 1.442695, %v318_v52  ;;  %v1225_v8 = vstv %s1186_s22  ;;  %v1228_v14 = vstv %s1190_s23 }
  0x3b   :  { %v406_v39 = vsel %vm60_vm0, %v1213_v57, -inf  ;;  %v407_v24 = vsel %vm60_vm0, %v1216_v59, -inf  ;;  %912 = vpow2.f32 %v319_v63  ;;  %v103_v45 = vstv %s1202_s24 }
  0x3c   :  { %914 = vpow2.f32 %v321_v6  ;;  %v152_v38 = vstv %s1210_s25  ;;  %v408_v40 = vmax.f32 %v406_v39, %v407_v24 }
  0x3e   :  { %v893_v7 = vpop.eup %892 }
  0x3f   :  { %v895_v18 = vpop.eup %894  ;;  %v76_v35 = vsel %vm60_vm0, %v893_v7, 0.0  ;;  %v85_v47 = vmul.f32 %v893_v7, %v1176_v33  ;;  %v362_v7 = vrot.slane %v361_v53, 2 }
  0x40   :  { %v897_v30 = vpop.eup %896  ;;  %v77_v1 = vsel %vm60_vm0, %v895_v18, 0.0  ;;  %v86_v48 = vmul.f32 %v895_v18, %v1178_v34  ;;  %v452_v18 = vrot.slane %v1208_v56, %v56_v9 }
  0x41   :  { %v899_v32 = vpop.eup %898  ;;  %v78_v41 = vadd.f32 %v77_v1, %v76_v35  ;;  %v127_v43 = vsel %vm60_vm0, %v897_v30, 0.0  ;;  %v87_v55 = vsel %vm60_vm0, %v85_v47, 0.0  ;;  %v136_v4 = vmul.f32 %v897_v30, %v1176_v33 }
  0x42   :  { %v128_v44 = vsel %vm60_vm0, %v899_v32, 0.0  ;;  %v901_v51 = vpop.eup %900  ;;  %v88_v3 = vsel %vm60_vm0, %v86_v48, 0.0  ;;  %v137_v62 = vmul.f32 %v899_v32, %v1178_v34  ;;  %v363_v9 = vmax.f32 %v361_v53, %v362_v7 }
  0x43   :  { %v129_v22 = vadd.f32 %v128_v44, %v127_v43  ;;  %v79_v26 = vrot.slane %v78_v41, 4  ;;  %v903_v54 = vpop.eup %902  ;;  %v89_v60 = vadd.f32 %v88_v3, %v87_v55  ;;  %v176_v61 = vsel %vm60_vm0, %v901_v51, 0.0 }
  0x44   :  { %v177_v10 = vsel %vm60_vm0, %v903_v54, 0.0  ;;  %v138_v0 = vsel %vm60_vm0, %v136_v4, 0.0  ;;  %v139_v5 = vsel %vm60_vm0, %v137_v62, 0.0  ;;  %v905_v29 = vpop.eup %904  ;;  %v185_v1 = vmul.f32 %v901_v51, %v1176_v33 }
  0x45   :  { %v130_v13 = vrot.slane %v129_v22, 4  ;;  %v80_v31 = vadd.f32 %v79_v26, %v78_v41  ;;  %v178_v21 = vadd.f32 %v177_v10, %v176_v61  ;;  %v90_v42 = vrot.slane %v89_v60, 4  ;;  %v907_v35 = vpop.eup %906 }
  0x46   :  { %v140_v32 = vadd.f32 %v139_v5, %v138_v0  ;;  %v186_v36 = vmul.f32 %v903_v54, %v1178_v34  ;;  %v1244_v41 = vmul.f32 %v452_v18, %v1079_v16  ;;  %v225_v47 = vsel %vm60_vm0, %v905_v29, 0.0  ;;  %v909_v25 = vpop.eup %908 }
  0x47   :  { %v131_v20 = vadd.f32 %v130_v13, %v129_v22  ;;  %v81_v30 = vrot.slane %v80_v31, 2  ;;  %v179_v44 = vrot.slane %v178_v21, 4  ;;  %v1248_v48 = vmul.f32 %v452_v18, %v1081_v17  ;;  %v911_v62 = vpop.eup %910 }
  0x48   :  { %v91_v49 = vadd.f32 %v90_v42, %v89_v60  ;;  %v141_v22 = vrot.slane %v140_v32, 4  ;;  %v226_v23 = vsel %vm60_vm0, %v907_v35, 0.0  ;;  %v187_v51 = vsel %vm60_vm0, %v185_v1, 0.0 }
  0x49   :  { %v132_v43 = vrot.slane %v131_v20, 2  ;;  %v82_v46 = vadd.f32 %v81_v30, %v80_v31  ;;  %v188_v26 = vsel %vm60_vm0, %v186_v36, 0.0  ;;  %v364_v52 = vrot.slane %v363_v9, 1 }
  0x4a   :  { %v501_v53 = vrot.slane %v1208_v56, %v108_v11  ;;  %v201_v54 = vstv %s1220_s26  ;;  %v250_v55 = vstv %s1230_s27  ;;  %v409_v3 = vrot.slane %v408_v40, 4 }
  0x4b   :  { %v455_v4 = vsel %vm60_vm0, %v1244_v41, -inf  ;;  %v133_v13 = vadd.f32 %v132_v43, %v131_v20  ;;  %v180_v63 = vadd.f32 %v179_v44, %v178_v21  ;;  %v227_v31 = vadd.f32 %v226_v23, %v225_v47  ;;  %v913_v44 = vpop.eup %912 }
  0x4c   :  { %v456_v60 = vsel %vm60_vm0, %v1248_v48, -inf  ;;  %v83_v61 = vrot.slane %v82_v46, 1  ;;  %v92_v10 = vrot.slane %v91_v49, 2  ;;  %v142_v0 = vadd.f32 %v141_v22, %v140_v32 }
  0x4d   :  { %v189_v5 = vadd.f32 %v188_v26, %v187_v51  ;;  %v234_v6 = vmul.f32 %v905_v29, %v1176_v33  ;;  %v1263_v11 = vmax.f32 %v363_v9, %v364_v52  ;;  %v1266_v7 = vmul.f32 %v501_v53, %v1079_v16  ;;  %v915_v51 = vpop.eup %914 }
  0x4e   :  { %v1269_v18 = vmul.f32 %v501_v53, %v1081_v17  ;;  %v235_v20 = vmul.f32 %v907_v35, %v1178_v34  ;;  %v274_v21 = vsel %vm60_vm0, %v909_v25, 0.0  ;;  %v275_v39 = vsel %vm60_vm0, %v911_v62, 0.0 }
  0x4f   :  { %v457_v24 = vmax.f32 %v455_v4, %v456_v60  ;;  %v134_v30 = vrot.slane %v133_v13, 1  ;;  %v181_v42 = vrot.slane %v180_v63, 2  ;;  %v228_v32 = vrot.slane %v227_v31, 4 }
  0x50   :  { %v410_v1 = vmax.f32 %v408_v40, %v409_v3  ;;  %v84_v29 = vadd.f32 %v83_v61, %v82_v46  ;;  %v93_v36 = vadd.f32 %v92_v10, %v91_v49  ;;  %v143_v9 = vrot.slane %v142_v0, 2 }
  0x51   :  { %v190_v43 = vrot.slane %v189_v5, 4  ;;  %v236_v47 = vsel %vm60_vm0, %v234_v6, 0.0  ;;  %v276_v22 = vadd.f32 %v275_v39, %v274_v21  ;;  %v366_v35 = vsub.f32 %v1162_v58, %v1263_v11 }
  0x52   :  { %v504_v23 = vsel %vm60_vm0, %v1266_v7, -inf  ;;  %v237_v26 = vsel %vm60_vm0, %v235_v20, 0.0  ;;  %v283_v52 = vmul.f32 %v909_v25, %v1176_v33  ;;  %v284_v40 = vmul.f32 %v911_v62, %v1178_v34 }
  0x53   :  { %v458_v46 = vrot.slane %v457_v24, 4  ;;  %v135_v49 = vadd.f32 %v134_v30, %v133_v13  ;;  %v182_v53 = vadd.f32 %v181_v42, %v180_v63  ;;  %v229_v3 = vadd.f32 %v228_v32, %v227_v31 }
  0x54   :  { %v411_v4 = vrot.slane %v410_v1, 2  ;;  %v94_v60 = vrot.slane %v93_v36, 1  ;;  %916 = vrcp.f32 %v84_v29  ;;  %v1282_v61 = vadd.f32 %v143_v9, %v142_v0 }
  0x55   :  { %v191_v58 = vadd.f32 %v190_v43, %v189_v5  ;;  %v238_v10 = vadd.f32 %v237_v26, %v236_v47  ;;  %v277_v6 = vrot.slane %v276_v22, 4  ;;  %v323_v21 = vsel %vm60_vm0, %v913_v44, 0.0 }
  0x56   :  { %v324_v20 = vsel %vm60_vm0, %v915_v51, 0.0  ;;  %v285_v25 = vsel %vm60_vm0, %v283_v52, 0.0  ;;  %v286_v62 = vsel %vm60_vm0, %v284_v40, 0.0  ;;  %v459_v39 = vmax.f32 %v457_v24, %v458_v46 }
  0x57   :  { %v505_v13 = vsel %vm60_vm0, %v1269_v18, -inf  ;;  %918 = vrcp.f32 %v135_v49  ;;  %v183_v63 = vrot.slane %v182_v53, 1  ;;  %v230_v31 = vrot.slane %v229_v3, 2 }
  0x58   :  { %v412_v0 = vmax.f32 %v410_v1, %v411_v4  ;;  %v325_v30 = vadd.f32 %v324_v20, %v323_v21  ;;  %v332_v5 = vmul.f32 %v913_v44, %v1176_v33  ;;  %v333_v42 = vmul.f32 %v915_v51, %v1178_v34 }
  0x59   :  { %v506_v32 = vmax.f32 %v504_v23, %v505_v13  ;;  %v95_v29 = vadd.f32 %v94_v60, %v93_v36  ;;  %v239_v9 = vrot.slane %v238_v10, 4  ;;  %v287_v43 = vadd.f32 %v286_v62, %v285_v25 }
  0x5a   :  { %v367_v47 = vsub.f32 %v1165_v27, %v1263_v11  ;;  %v192_v24 = vrot.slane %v191_v58, 2  ;;  %v278_v26 = vadd.f32 %v277_v6, %v276_v22  ;;  %v460_v52 = vrot.slane %v459_v39, 2 }
  0x5b   :  { %v550_v40 = vrot.slane %v1208_v56, %v157_v12  ;;  %v184_v1 = vadd.f32 %v183_v63, %v182_v53  ;;  %v231_v46 = vadd.f32 %v230_v31, %v229_v3  ;;  %v413_v49 = vrot.slane %v412_v0, 1 }
  0x5c   :  { %v507_v44 = vrot.slane %v506_v32, 4  ;;  %v326_v4 = vrot.slane %v325_v30, 4  ;;  %v334_v23 = vsel %vm60_vm0, %v332_v5, 0.0  ;;  %v335_v36 = vsel %vm60_vm0, %v333_v42, 0.0 }
  0x5d   :  { %v368_v51 = vmul.f32 1.442695, %v366_v35  ;;  %v145_v60 = vrot.slane %v1282_v61, 1  ;;  %v240_v27 = vadd.f32 %v239_v9, %v238_v10  ;;  %v288_v11 = vrot.slane %v287_v43, 4 }
  0x5e   :  { %v370_v22 = vmul.f32 1.442695, %v367_v47  ;;  %v193_v6 = vadd.f32 %v192_v24, %v191_v58  ;;  %v279_v21 = vrot.slane %v278_v26, 2  ;;  %v461_v20 = vmax.f32 %v459_v39, %v460_v52 }
  0x5f   :  { %v1301_v12 = vmul.f32 %v550_v40, %v1079_v16  ;;  %920 = vrcp.f32 %v184_v1  ;;  %v336_v53 = vadd.f32 %v335_v36, %v334_v23  ;;  %v414_v3 = vmax.f32 %v412_v0, %v413_v49 }
  0x60   :  { %v508_v25 = vmax.f32 %v506_v32, %v507_v44  ;;  %v232_v62 = vrot.slane %v231_v46, 1  ;;  %v327_v13 = vadd.f32 %v326_v4, %v325_v30  ;;  %922 = vpow2.f32 %v368_v51 }
  0x61   :  { %v1304_v35 = vmul.f32 %v550_v40, %v1081_v17  ;;  %v917_v63 = vpop.eup %916  ;;  %v241_v10 = vrot.slane %v240_v27, 2  ;;  %v289_v31 = vadd.f32 %v288_v11, %v287_v43  ;;  %924 = vpow2.f32 %v370_v22 }
  0x62   :  { %v553_v58 = vsel %vm60_vm0, %v1301_v12, -inf  ;;  %v280_v39 = vadd.f32 %v279_v21, %v278_v26  ;;  %v462_v5 = vrot.slane %v461_v20, 1  ;;  %v599_v0 = vrot.slane %v1208_v56, %v206_v15 }
  0x63   :  { %v554_v42 = vsel %vm60_vm0, %v1304_v35, -inf  ;;  %v194_v30 = vrot.slane %v193_v6, 1  ;;  %v337_v32 = vrot.slane %v336_v53, 4  ;;  %v415_v9 = vsub.f32 %v1213_v57, %v414_v3 }
  0x64   :  { %v509_v47 = vrot.slane %v508_v25, 2  ;;  %v919_v24 = vpop.eup %918  ;;  %v146_v43 = vadd.f32 %v145_v60, %v1282_v61  ;;  %v328_v52 = vrot.slane %v327_v13, 2  ;;  %v416_v40 = vsub.f32 %v1216_v59, %v414_v3 }
  0x65   :  { %v555_v26 = vmax.f32 %v553_v58, %v554_v42  ;;  %v97_v1 = vmul.f32 %v917_v63, %v95_v29  ;;  %v233_v49 = vadd.f32 %v232_v62, %v231_v46  ;;  %v242_v44 = vadd.f32 %v241_v10, %v240_v27 }
  0x66   :  { %v290_v4 = vrot.slane %v289_v31, 2  ;;  %v281_v23 = vrot.slane %v280_v39, 1  ;;  %v463_v15 = vmax.f32 %v461_v20, %v462_v5  ;;  %v1319_v36 = vmul.f32 %v599_v0, %v1079_v16 }
  0x67   :  { %v1322_v57 = vmul.f32 %v599_v0, %v1081_v17  ;;  %v195_v51 = vadd.f32 %v194_v30, %v193_v6  ;;  %v338_v61 = vadd.f32 %v337_v32, %v336_v53  ;;  %v417_v60 = vmul.f32 1.442695, %v415_v9 }
  0x68   :  { %v510_v11 = vmax.f32 %v508_v25, %v509_v47  ;;  %v148_v59 = vmul.f32 %v919_v24, %v146_v43  ;;  %v329_v22 = vadd.f32 %v328_v52, %v327_v13  ;;  %v419_v29 = vmul.f32 1.442695, %v416_v40 }
  0x69   :  { %v556_v46 = vrot.slane %v555_v26, 4  ;;  %v99_v27 = vmul.f32 %v1225_v8, %v97_v1  ;;  %v243_v21 = vrot.slane %v242_v44, 1  ;;  %926 = vrcp.f32 %v233_v49 }
  0x6a   :  { %v291_v3 = vadd.f32 %v290_v4, %v289_v31  ;;  %v282_v20 = vadd.f32 %v281_v23, %v280_v39  ;;  %v464_v62 = vsub.f32 %v1244_v41, %v463_v15  ;;  %v602_v63 = vsel %vm60_vm0, %v1319_v36, -inf }
  0x6b   :  { %v603_v6 = vsel %vm60_vm0, %v1322_v57, -inf  ;;  %v339_v53 = vrot.slane %v338_v61, 2  ;;  %928 = vpow2.f32 %v417_v60  ;;  %v465_v25 = vsub.f32 %v1248_v48, %v463_v15 }
  0x6c   :  { %v511_v13 = vrot.slane %v510_v11, 1  ;;  %v921_v10 = vpop.eup %920  ;;  %v149_v58 = vmul.f32 %v148_v59, %v1225_v8  ;;  %v330_v5 = vrot.slane %v329_v22, 1  ;;  %930 = vpow2.f32 %v419_v29 }
  0x6d   :  { %v557_v31 = vmax.f32 %v555_v26, %v556_v46  ;;  %v923_v39 = vpop.eup %922  ;;  %v244_v42 = vadd.f32 %v243_v21, %v242_v44  ;;  %v292_v41 = vrot.slane %v291_v3, 1  ;;  %v299_v0 = vstv %s1316_s28 }
  0x6e   :  { %v604_v30 = vmax.f32 %v602_v63, %v603_v6  ;;  %v925_v32 = vpop.eup %924  ;;  %v101_v9 = vadd.f32 %v1228_v14, %v99_v27  ;;  %v466_v47 = vmul.f32 1.442695, %v464_v62  ;;  %v648_v48 = vrot.slane %v1208_v56, %v255_v19 }
  0x6f   :  { %v558_v24 = vrot.slane %v557_v31, 2  ;;  %v197_v43 = vmul.f32 %v921_v10, %v195_v51  ;;  %932 = vrcp.f32 %v282_v20  ;;  %v468_v52 = vmul.f32 1.442695, %v465_v25 }
  0x70   :  { %v512_v40 = vmax.f32 %v510_v11, %v511_v13  ;;  %v150_v26 = vadd.f32 %v149_v58, %v1228_v14  ;;  %v331_v1 = vadd.f32 %v330_v5, %v329_v22  ;;  %v1338_v49 = vadd.f32 %v339_v53, %v338_v61 }
  0x71   :  { %v559_v44 = vmax.f32 %v557_v31, %v558_v24  ;;  %v372_v4 = vsel %vm60_vm0, %v923_v39, 0.0  ;;  %v373_v23 = vsel %vm60_vm0, %v925_v32, 0.0  ;;  %v381_v15 = vmul.f32 %v923_v39, %v1176_v33 }
  0x72   :  { %v605_v60 = vrot.slane %v604_v30, 4  ;;  %v382_v59 = vmul.f32 %v925_v32, %v1178_v34  ;;  %934 = vpow2.f32 %v466_v47  ;;  %v1345_v51 = vmul.f32 %v648_v48, %v1079_v16 }
  0x73   :  { %v560_v19 = vrot.slane %v559_v44, 1  ;;  %936 = vpow2.f32 %v468_v52  ;;  %v513_v61 = vsub.f32 %v1266_v7, %v512_v40  ;;  %v1349_v22 = vmul.f32 %v648_v48, %v1081_v17 }
  0x74   :  { %v606_v11 = vmax.f32 %v604_v30, %v605_v60  ;;  %v198_v29 = vmul.f32 %v197_v43, %v1225_v8  ;;  %v514_v46 = vsub.f32 %v1269_v18, %v512_v40  ;;  %v651_v21 = vsel %vm60_vm0, %v1345_v51, -inf }
  0x75   :  { %v561_v27 = vmax.f32 %v559_v44, %v560_v19  ;;  %v293_v20 = vadd.f32 %v292_v41, %v291_v3  ;;  %v374_v62 = vadd.f32 %v373_v23, %v372_v4  ;;  %v652_v6 = vsel %vm60_vm0, %v1349_v22, -inf }
  0x76   :  { %v607_v63 = vrot.slane %v606_v11, 2  ;;  %v927_v53 = vpop.eup %926  ;;  %v104_v7 = vmul.f32 %v103_v45, %v101_v9  ;;  %v153_v25 = vmul.f32 %v152_v38, %v150_v26  ;;  %v341_v13 = vrot.slane %v1338_v49, 1 }
  0x77   :  { %v383_v10 = vsel %vm60_vm0, %v381_v15, 0.0  ;;  %v384_v18 = vsel %vm60_vm0, %v382_v59, 0.0  ;;  %v515_v58 = vmul.f32 1.442695, %v513_v61  ;;  %v653_v31 = vmax.f32 %v651_v21, %v652_v6 }
  0x78   :  { %v608_v5 = vmax.f32 %v606_v11, %v607_v63  ;;  %v929_v3 = vpop.eup %928  ;;  %v199_v39 = vadd.f32 %v198_v29, %v1228_v14  ;;  %938 = vrcp.f32 %v331_v1  ;;  %v517_v41 = vmul.f32 1.442695, %v514_v46 }
  0x79   :  { %v562_v30 = vsub.f32 %v1301_v12, %v561_v27  ;;  %v931_v32 = vpop.eup %930  ;;  %v375_v45 = vrot.slane %v374_v62, 4  ;;  %v563_v38 = vsub.f32 %v1304_v35, %v561_v27  ;;  %v654_v47 = vrot.slane %v653_v31, 4 }
  0x7a   :  { %v609_v9 = vrot.slane %v608_v5, 1  ;;  %v246_v24 = vmul.f32 %v927_v53, %v244_v42  ;;  %v385_v48 = vadd.f32 %v384_v18, %v383_v10  ;;  %v430_v43 = vmul.f32 %v929_v3, %v1176_v33 }
  0x7b   :  { %v431_v52 = vmul.f32 %v931_v32, %v1178_v34  ;;  %v421_v40 = vsel %vm60_vm0, %v929_v3, 0.0  ;;  %940 = vpow2.f32 %v515_v58  ;;  %v655_v1 = vmax.f32 %v653_v31, %v654_v47 }
  0x7c   :  { %v610_v26 = vmax.f32 %v608_v5, %v609_v9  ;;  %v933_v44 = vpop.eup %932  ;;  %v422_v12 = vsel %vm60_vm0, %v931_v32, 0.0  ;;  %942 = vpow2.f32 %v517_v41  ;;  %v564_v4 = vmul.f32 1.442695, %v562_v30 }
  0x7d   :  { %v697_v35 = vrot.slane %v1208_v56, %v304_v28  ;;  %v376_v42 = vadd.f32 %v375_v45, %v374_v62  ;;  %v566_v23 = vmul.f32 1.442695, %v563_v38  ;;  %v656_v60 = vrot.slane %v655_v1, 2 }
  0x7e   :  { %v611_v15 = vsub.f32 %v1319_v36, %v610_v26  ;;  %v154_v59 = vadd.f32 %v153_v25, %v104_v7  ;;  %v432_v19 = vsel %vm60_vm0, %v430_v43, 0.0  ;;  %v433_v61 = vsel %vm60_vm0, %v431_v52, 0.0 }
  0x7f   :  { %v612_v11 = vsub.f32 %v1322_v57, %v610_v26  ;;  %v935_v29 = vpop.eup %934  ;;  %v202_v46 = vmul.f32 %v201_v54, %v199_v39  ;;  %v247_v27 = vmul.f32 %v246_v24, %v1225_v8  ;;  %v295_v21 = vmul.f32 %v933_v44, %v293_v20 }
  0x80   :  { %v423_v63 = vadd.f32 %v422_v12, %v421_v40  ;;  %v937_v28 = vpop.eup %936  ;;  %v386_v62 = vrot.slane %v385_v48, 4  ;;  %944 = vpow2.f32 %v564_v4  ;;  %v657_v6 = vmax.f32 %v655_v1, %v656_v60 }
  0x81   :  { %v1382_v36 = vmul.f32 %v697_v35, %v1079_v16  ;;  %v377_v53 = vrot.slane %v376_v42, 2  ;;  %v434_v7 = vadd.f32 %v433_v61, %v432_v19  ;;  %946 = vpow2.f32 %v566_v23 }
  0x82   :  { %v613_v25 = vmul.f32 1.442695, %v611_v15  ;;  %v615_v10 = vmul.f32 1.442695, %v612_v11  ;;  %v658_v57 = vrot.slane %v657_v6, 1  ;;  %v1385_v18 = vmul.f32 %v697_v35, %v1081_v17 }
  0x83   :  { %v700_v54 = vsel %vm60_vm0, %v1382_v36, -inf  ;;  %v248_v20 = vadd.f32 %v247_v27, %v1228_v14  ;;  %v424_v58 = vrot.slane %v423_v63, 4  ;;  %v470_v5 = vsel %vm60_vm0, %v935_v29, 0.0 }
  0x84   :  { %v471_v31 = vsel %vm60_vm0, %v937_v28, 0.0  ;;  %v296_v3 = vmul.f32 %v295_v21, %v1225_v8  ;;  %v387_v39 = vadd.f32 %v386_v62, %v385_v48  ;;  %v659_v41 = vmax.f32 %v657_v6, %v658_v57 }
  0x85   :  { %v701_v30 = vsel %vm60_vm0, %v1385_v18, -inf  ;;  %v939_v32 = vpop.eup %938  ;;  %v378_v45 = vadd.f32 %v377_v53, %v376_v42  ;;  %v435_v38 = vrot.slane %v434_v7, 4  ;;  %948 = vpow2.f32 %v613_v25 }
  0x86   :  { %v702_v9 = vmax.f32 %v700_v54, %v701_v30  ;;  %v472_v47 = vadd.f32 %v471_v31, %v470_v5  ;;  %950 = vpow2.f32 %v615_v10  ;;  %v660_v24 = vsub.f32 %v1345_v51, %v659_v41 }
  0x87   :  { %v661_v43 = vsub.f32 %v1349_v22, %v659_v41  ;;  %v203_v52 = vadd.f32 %v202_v46, %v154_v59  ;;  %v342_v48 = vadd.f32 %v341_v13, %v1338_v49  ;;  %v425_v40 = vadd.f32 %v424_v58, %v423_v63 }
  0x88   :  { %v746_v26 = vrot.slane %v1208_v56, %v353_v50  ;;  %v941_v1 = vpop.eup %940  ;;  %v251_v44 = vmul.f32 %v250_v55, %v248_v20  ;;  %v662_v12 = vmul.f32 1.442695, %v660_v24  ;;  %v703_v51 = vrot.slane %v702_v9, 4 }
  0x89   :  { %v664_v4 = vmul.f32 1.442695, %v661_v43  ;;  %v943_v35 = vpop.eup %942  ;;  %v388_v22 = vrot.slane %v387_v39, 2  ;;  %v436_v42 = vadd.f32 %v435_v38, %v434_v7  ;;  %v479_v23 = vmul.f32 %v935_v29, %v1176_v33 }
  0x8a   :  { %v480_v49 = vmul.f32 %v937_v28, %v1178_v34  ;;  %v297_v13 = vadd.f32 %v296_v3, %v1228_v14  ;;  %v379_v15 = vrot.slane %v378_v45, 1  ;;  %v473_v60 = vrot.slane %v472_v47, 4 }
  0x8b   :  { %952 = vpow2.f32 %v662_v12  ;;  %v426_v50 = vrot.slane %v425_v40, 2  ;;  %v1413_v55 = vmul.f32 %v746_v26, %v1079_v16  ;;  %v1416_v59 = vmul.f32 %v746_v26, %v1081_v17 }
  0x8c   :  { %954 = vpow2.f32 %v664_v4  ;;  %v344_v19 = vmul.f32 %v939_v32, %v342_v48  ;;  %v519_v61 = vsel %vm60_vm0, %v941_v1, 0.0  ;;  %v520_v11 = vsel %vm60_vm0, %v943_v35, 0.0 }
  0x8d   :  { %v704_v29 = vmax.f32 %v702_v9, %v703_v51  ;;  %v1420_v46 = vpop.eup %944  ;;  %v389_v27 = vadd.f32 %v388_v22, %v387_v39  ;;  %v437_v21 = vrot.slane %v436_v42, 2  ;;  %v481_v63 = vsel %vm60_vm0, %v479_v23, 0.0 }
  0x8e   :  { %v482_v28 = vsel %vm60_vm0, %v480_v49, 0.0  ;;  %v1424_v62 = vpop.eup %946  ;;  %v348_v6 = vstv %s1395_s29  ;;  %v380_v53 = vadd.f32 %v379_v15, %v378_v45  ;;  %v474_v7 = vadd.f32 %v473_v60, %v472_v47 }
  0x8f   :  { %v705_v25 = vrot.slane %v704_v29, 2  ;;  %v427_v10 = vadd.f32 %v426_v50, %v425_v40  ;;  %v521_v57 = vadd.f32 %v520_v11, %v519_v61  ;;  %v749_v54 = vsel %vm60_vm0, %v1413_v55, -inf }
  0x90   :  { %v750_v20 = vsel %vm60_vm0, %v1416_v59, -inf  ;;  %v1431_v58 = vadd.f32 %v251_v44, %v203_v52  ;;  %v345_v5 = vmul.f32 %v344_v19, %v1225_v8  ;;  %v397_v31 = vstv %s1402_s30 }
  0x91   :  { %v483_v3 = vadd.f32 %v482_v28, %v481_v63  ;;  %v1437_v39 = vmul.f32 %v299_v0, %v297_v13  ;;  %v390_v41 = vrot.slane %v389_v27, 1  ;;  %v438_v30 = vadd.f32 %v437_v21, %v436_v42 }
  0x92   :  { %v706_v32 = vmax.f32 %v704_v29, %v705_v25  ;;  %v1439_v45 = vpop.eup %948  ;;  %v475_v38 = vrot.slane %v474_v7, 2  ;;  %v568_v9 = vsel %vm60_vm0, %v1420_v46, 0.0  ;;  %v569_v47 = vsel %vm60_vm0, %v1424_v62, 0.0 }
  0x93   :  { %v751_v24 = vmax.f32 %v749_v54, %v750_v20  ;;  %v1445_v43 = vpop.eup %950  ;;  %956 = vrcp.f32 %v380_v53  ;;  %v428_v52 = vrot.slane %v427_v10, 1  ;;  %v522_v48 = vrot.slane %v521_v57, 4 }
  0x94   :  { %v707_v0 = vrot.slane %v706_v32, 1  ;;  %v1448_v40 = vadd.f32 %v345_v5, %v1228_v14  ;;  %v484_v26 = vrot.slane %v483_v3, 4  ;;  %v528_v44 = vmul.f32 %v941_v1, %v1176_v33 }
  0x95   :  { %v752_v12 = vrot.slane %v751_v24, 4  ;;  %v529_v4 = vmul.f32 %v943_v35, %v1178_v34  ;;  %v570_v51 = vadd.f32 %v569_v47, %v568_v9  ;;  %v795_v42 = vrot.slane %v1208_v56, %v402_v37 }
  0x96   :  { %v708_v22 = vmax.f32 %v706_v32, %v707_v0  ;;  %v439_v23 = vrot.slane %v438_v30, 1  ;;  %v476_v49 = vadd.f32 %v475_v38, %v474_v7  ;;  %v617_v13 = vsel %vm60_vm0, %v1439_v45, 0.0 }
  0x97   :  { %v618_v15 = vsel %vm60_vm0, %v1445_v43, 0.0  ;;  %v391_v1 = vadd.f32 %v390_v41, %v389_v27  ;;  %v429_v50 = vadd.f32 %v428_v52, %v427_v10  ;;  %v523_v19 = vadd.f32 %v522_v48, %v521_v57 }
  0x98   :  { %v1459_v60 = vpop.eup %952  ;;  %v709_v35 = vsub.f32 %v1382_v36, %v708_v22  ;;  %v485_v2 = vadd.f32 %v484_v26, %v483_v3  ;;  %v530_v37 = vsel %vm60_vm0, %v528_v44, 0.0  ;;  %v710_v56 = vsub.f32 %v1385_v18, %v708_v22 }
  0x99   :  { %v1462_v61 = vpop.eup %954  ;;  %v753_v11 = vmax.f32 %v751_v24, %v752_v12  ;;  %v531_v29 = vsel %vm60_vm0, %v529_v4, 0.0  ;;  %v571_v21 = vrot.slane %v570_v51, 4  ;;  %v619_v63 = vadd.f32 %v618_v15, %v617_v13 }
  0x9a   :  { %v1468_v28 = vmul.f32 %v795_v42, %v1079_v16  ;;  %v1470_v27 = vadd.f32 %v439_v23, %v438_v30  ;;  %v477_v53 = vrot.slane %v476_v49, 1  ;;  %v711_v7 = vmul.f32 1.442695, %v709_v35 }
  0x9b   :  { %v1473_v36 = vmul.f32 %v795_v42, %v1081_v17  ;;  %v524_v25 = vrot.slane %v523_v19, 2  ;;  %v666_v10 = vsel %vm60_vm0, %v1459_v60, 0.0  ;;  %v667_v18 = vsel %vm60_vm0, %v1462_v61, 0.0 }
  0x9c   :  { %v713_v57 = vmul.f32 1.442695, %v710_v56  ;;  %v532_v54 = vadd.f32 %v531_v29, %v530_v37  ;;  %v577_v16 = vmul.f32 %v1420_v46, %v1176_v33  ;;  %958 = vpow2.f32 %v711_v7 }
  0x9d   :  { %v754_v20 = vrot.slane %v753_v11, 2  ;;  %v572_v5 = vadd.f32 %v571_v21, %v570_v51  ;;  %v578_v3 = vmul.f32 %v1424_v62, %v1178_v34  ;;  %v620_v17 = vrot.slane %v619_v63, 4 }
  0x9e   :  { %v798_v41 = vsel %vm60_vm0, %v1468_v28, -inf  ;;  %v668_v30 = vadd.f32 %v667_v18, %v666_v10  ;;  %960 = vpow2.f32 %v713_v57  ;;  %v799_v38 = vsel %vm60_vm0, %v1473_v36, -inf }
  0x9f   :  { %v755_v32 = vmax.f32 %v753_v11, %v754_v20  ;;  %962 = vrcp.f32 %v429_v50  ;;  %v478_v9 = vadd.f32 %v477_v53, %v476_v49  ;;  %v486_v47 = vrot.slane %v485_v2, 2 }
  0xa0   :  { %v525_v46 = vadd.f32 %v524_v25, %v523_v19  ;;  %v957_v24 = vpop.eup %956  ;;  %v533_v52 = vrot.slane %v532_v54, 4  ;;  %v579_v48 = vsel %vm60_vm0, %v577_v16, 0.0  ;;  %v800_v62 = vmax.f32 %v798_v41, %v799_v38 }
  0xa1   :  { %v756_v0 = vrot.slane %v755_v32, 1  ;;  %v573_v26 = vrot.slane %v572_v5, 2  ;;  %v580_v44 = vsel %vm60_vm0, %v578_v3, 0.0  ;;  %v626_v12 = vmul.f32 %v1439_v45, %v1176_v33 }
  0xa2   :  { %v627_v4 = vmul.f32 %v1445_v43, %v1178_v34  ;;  %v621_v51 = vadd.f32 %v620_v17, %v619_v63  ;;  %v669_v22 = vrot.slane %v668_v30, 4  ;;  %v801_v23 = vrot.slane %v800_v62, 4 }
  0xa3   :  { %v757_v42 = vmax.f32 %v755_v32, %v756_v0  ;;  %v393_v49 = vmul.f32 %v957_v24, %v391_v1  ;;  %v487_v13 = vadd.f32 %v486_v47, %v485_v2  ;;  %964 = vrcp.f32 %v478_v9 }
  0xa4   :  { %v526_v15 = vrot.slane %v525_v46, 1  ;;  %v534_v50 = vadd.f32 %v533_v52, %v532_v54  ;;  %v802_v37 = vmax.f32 %v800_v62, %v801_v23  ;;  %v574_v56 = vadd.f32 %v573_v26, %v572_v5 }
  0xa5   :  { %v758_v19 = vsub.f32 %v1413_v55, %v757_v42  ;;  %v759_v35 = vsub.f32 %v1416_v59, %v757_v42  ;;  %v581_v11 = vadd.f32 %v580_v44, %v579_v48  ;;  %v628_v45 = vsel %vm60_vm0, %v626_v12, 0.0 }
  0xa6   :  { %v629_v43 = vsel %vm60_vm0, %v627_v4, 0.0  ;;  %v622_v29 = vrot.slane %v621_v51, 2  ;;  %v670_v21 = vadd.f32 %v669_v22, %v668_v30  ;;  %v527_v1 = vadd.f32 %v526_v15, %v525_v46 }
  0xa7   :  { %v760_v63 = vmul.f32 1.442695, %v758_v19  ;;  %v762_v53 = vmul.f32 1.442695, %v759_v35  ;;  %v675_v2 = vmul.f32 %v1459_v60, %v1176_v33  ;;  %v676_v55 = vmul.f32 %v1462_v61, %v1178_v34 }
  0xa8   :  { %v803_v7 = vrot.slane %v802_v37, 2  ;;  %v394_v59 = vmul.f32 %v393_v49, %v1225_v8  ;;  %v488_v25 = vrot.slane %v487_v13, 1  ;;  %v535_v10 = vrot.slane %v534_v50, 2 }
  0xa9   :  { %v630_v18 = vadd.f32 %v629_v43, %v628_v45  ;;  %v959_v57 = vpop.eup %958  ;;  %v575_v54 = vrot.slane %v574_v56, 1  ;;  %v582_v16 = vrot.slane %v581_v11, 4  ;;  %966 = vpow2.f32 %v760_v63 }
  0xaa   :  { %v804_v20 = vmax.f32 %v802_v37, %v803_v7  ;;  %v623_v5 = vadd.f32 %v622_v29, %v621_v51  ;;  %v671_v3 = vrot.slane %v670_v21, 2  ;;  %v715_v17 = vsel %vm60_vm0, %v959_v57, 0.0 }
  0xab   :  { %968 = vpow2.f32 %v762_v53  ;;  %v961_v60 = vpop.eup %960  ;;  %v677_v61 = vsel %vm60_vm0, %v675_v2, 0.0  ;;  %v678_v41 = vsel %vm60_vm0, %v676_v55, 0.0  ;;  %v631_v38 = vrot.slane %v630_v18, 4 }
  0xac   :  { %970 = vrcp.f32 %v527_v1  ;;  %v805_v30 = vrot.slane %v804_v20, 1  ;;  %v963_v32 = vpop.eup %962  ;;  %v716_v9 = vsel %vm60_vm0, %v961_v60, 0.0  ;;  %v724_v47 = vmul.f32 %v959_v57, %v1176_v33 }
  0xad   :  { %v725_v46 = vmul.f32 %v961_v60, %v1178_v34  ;;  %v576_v24 = vadd.f32 %v575_v54, %v574_v56  ;;  %v583_v52 = vadd.f32 %v582_v16, %v581_v11  ;;  %v717_v48 = vadd.f32 %v716_v9, %v715_v17 }
  0xae   :  { %v806_v0 = vmax.f32 %v804_v20, %v805_v30  ;;  %v489_v62 = vadd.f32 %v488_v25, %v487_v13  ;;  %v624_v26 = vrot.slane %v623_v5, 1  ;;  %v672_v44 = vadd.f32 %v671_v3, %v670_v21 }
  0xaf   :  { %v679_v12 = vadd.f32 %v678_v41, %v677_v61  ;;  %v442_v4 = vmul.f32 %v963_v32, %v1470_v27  ;;  %v536_v51 = vadd.f32 %v535_v10, %v534_v50  ;;  %v718_v22 = vrot.slane %v717_v48, 4 }
  0xb0   :  { %v807_v42 = vsub.f32 %v1468_v28, %v806_v0  ;;  %v965_v23 = vpop.eup %964  ;;  %v632_v49 = vadd.f32 %v631_v38, %v630_v18  ;;  %v726_v15 = vsel %vm60_vm0, %v724_v47, 0.0  ;;  %v727_v19 = vsel %vm60_vm0, %v725_v46, 0.0 }
  0xb1   :  { %v808_v35 = vsub.f32 %v1473_v36, %v806_v0  ;;  %v584_v37 = vrot.slane %v583_v52, 2  ;;  %972 = vrcp.f32 %v576_v24  ;;  %v719_v13 = vadd.f32 %v718_v22, %v717_v48 }
  0xb2   :  { %v809_v56 = vmul.f32 1.442695, %v807_v42  ;;  %v625_v11 = vadd.f32 %v624_v26, %v623_v5  ;;  %v673_v45 = vrot.slane %v672_v44, 1  ;;  %v680_v27 = vrot.slane %v679_v12, 4 }
  0xb3   :  { %v811_v50 = vmul.f32 1.442695, %v808_v35  ;;  %v301_v28 = vadd.f32 %v1437_v39, %v1431_v58  ;;  %v720_v43 = vrot.slane %v719_v13, 2  ;;  %v728_v29 = vadd.f32 %v727_v19, %v726_v15 }
  0xb4   :  { %974 = vpow2.f32 %v809_v56  ;;  %v349_v21 = vmul.f32 %v348_v6, %v1448_v40  ;;  %v537_v63 = vrot.slane %v536_v51, 1  ;;  %v633_v53 = vrot.slane %v632_v49, 2 }
  0xb5   :  { %976 = vpow2.f32 %v811_v50  ;;  %v395_v36 = vadd.f32 %v394_v59, %v1228_v14  ;;  %v443_v1 = vmul.f32 %v442_v4, %v1225_v8  ;;  %v491_v2 = vmul.f32 %v965_v23, %v489_v62 }
  0xb6   :  { %v721_v55 = vadd.f32 %v720_v43, %v719_v13  ;;  %v967_v7 = vpop.eup %966  ;;  %v585_v58 = vadd.f32 %v584_v37, %v583_v52  ;;  %978 = vrcp.f32 %v625_v11  ;;  %v674_v39 = vadd.f32 %v673_v45, %v672_v44 }
  0xb7   :  { %v681_v25 = vadd.f32 %v680_v27, %v679_v12  ;;  %v729_v10 = vrot.slane %v728_v29, 4  ;;  %v764_v18 = vsel %vm60_vm0, %v967_v7, 0.0  ;;  %v773_v59 = vmul.f32 %v967_v7, %v1176_v33 }
  0xb8   :  { %v969_v6 = vpop.eup %968  ;;  %v722_v40 = vrot.slane %v721_v55, 1  ;;  %v538_v54 = vadd.f32 %v537_v63, %v536_v51  ;;  %v634_v16 = vadd.f32 %v633_v53, %v632_v49  ;;  %v350_v3 = vadd.f32 %v349_v21, %v301_v28 }
  0xb9   :  { %v971_v57 = vpop.eup %970  ;;  %v765_v20 = vsel %vm60_vm0, %v969_v6, 0.0  ;;  %v774_v5 = vmul.f32 %v969_v6, %v1178_v34  ;;  %v398_v17 = vmul.f32 %v397_v31, %v395_v36  ;;  %v775_v61 = vsel %vm60_vm0, %v773_v59, 0.0 }
  0xba   :  { %v766_v60 = vadd.f32 %v765_v20, %v764_v18  ;;  %v586_v41 = vrot.slane %v585_v58, 1  ;;  %v682_v30 = vrot.slane %v681_v25, 2  ;;  %980 = vrcp.f32 %v674_v39 }
  0xbb   :  { %v776_v32 = vsel %vm60_vm0, %v774_v5, 0.0  ;;  %v723_v38 = vadd.f32 %v722_v40, %v721_v55  ;;  %v730_v9 = vadd.f32 %v729_v10, %v728_v29  ;;  %v444_v24 = vadd.f32 %v443_v1, %v1228_v14 }
  0xbc   :  { %v767_v47 = vrot.slane %v766_v60, 4  ;;  %v777_v46 = vadd.f32 %v776_v32, %v775_v61  ;;  %v492_v52 = vmul.f32 %v491_v2, %v1225_v8  ;;  %v540_v48 = vmul.f32 %v971_v57, %v538_v54 }
  0xbd   :  { %v635_v31 = vrot.slane %v634_v16, 1  ;;  %v446_v0 = vstv %s1520_s3  ;;  %v495_v12 = vstv %s1522_s4  ;;  %v587_v4 = vadd.f32 %v586_v41, %v585_v58 }
  0xbe   :  { %v768_v62 = vadd.f32 %v767_v47, %v766_v60  ;;  %v778_v26 = vrot.slane %v777_v46, 4  ;;  %v973_v44 = vpop.eup %972  ;;  %v683_v51 = vadd.f32 %v682_v30, %v681_v25  ;;  %v399_v22 = vadd.f32 %v398_v17, %v350_v3 }
  0xbf   :  { %v731_v42 = vrot.slane %v730_v9, 2  ;;  %982 = vrcp.f32 %v723_v38  ;;  %v447_v15 = vmul.f32 %v446_v0, %v444_v24  ;;  %v493_v19 = vadd.f32 %v492_v52, %v1228_v14 }
  0xc0   :  { %v769_v23 = vrot.slane %v768_v62, 2  ;;  %v541_v35 = vmul.f32 %v540_v48, %v1225_v8  ;;  %v636_v37 = vadd.f32 %v635_v31, %v634_v16  ;;  %v779_v11 = vadd.f32 %v778_v26, %v777_v46 }
  0xc1   :  { %v975_v49 = vpop.eup %974  ;;  %v589_v50 = vmul.f32 %v973_v44, %v587_v4  ;;  %v684_v28 = vrot.slane %v683_v51, 1  ;;  %v732_v63 = vadd.f32 %v731_v42, %v730_v9  ;;  %v448_v2 = vadd.f32 %v447_v15, %v399_v22 }
  0xc2   :  { %v977_v13 = vpop.eup %976  ;;  %v770_v56 = vadd.f32 %v769_v23, %v768_v62  ;;  %v813_v45 = vsel %vm60_vm0, %v975_v49, 0.0  ;;  %v822_v27 = vmul.f32 %v975_v49, %v1176_v33  ;;  %v496_v55 = vmul.f32 %v495_v12, %v493_v19 }
  0xc3   :  { %v814_v43 = vsel %vm60_vm0, %v977_v13, 0.0  ;;  %v823_v29 = vmul.f32 %v977_v13, %v1178_v34  ;;  %v979_v21 = vpop.eup %978  ;;  %v544_v7 = vstv %s1534_s5  ;;  %v780_v33 = vrot.slane %v779_v11, 2 }
  0xc4   :  { %v771_v53 = vrot.slane %v770_v56, 1  ;;  %v815_v36 = vadd.f32 %v814_v43, %v813_v45  ;;  %v824_v1 = vsel %vm60_vm0, %v822_v27, 0.0  ;;  %v542_v40 = vadd.f32 %v541_v35, %v1228_v14 }
  0xc5   :  { %v825_v58 = vsel %vm60_vm0, %v823_v29, 0.0  ;;  %v590_v34 = vmul.f32 %v589_v50, %v1225_v8  ;;  %v638_v10 = vmul.f32 %v979_v21, %v636_v37  ;;  %v685_v18 = vadd.f32 %v684_v28, %v683_v51 }
  0xc6   :  { %v772_v39 = vadd.f32 %v771_v53, %v770_v56  ;;  %v816_v25 = vrot.slane %v815_v36, 4  ;;  %v826_v6 = vadd.f32 %v825_v58, %v824_v1  ;;  %v733_v57 = vrot.slane %v732_v63, 1 }
  0xc7   :  { %v981_v59 = vpop.eup %980  ;;  %v593_v20 = vstv %s1540_s6  ;;  %v781_v5 = vadd.f32 %v780_v33, %v779_v11  ;;  %v497_v17 = vadd.f32 %v496_v55, %v448_v2  ;;  %v545_v60 = vmul.f32 %v544_v7, %v542_v40 }
  0xc8   :  { %984 = vrcp.f32 %v772_v39  ;;  %v817_v54 = vadd.f32 %v816_v25, %v815_v36  ;;  %v827_v16 = vrot.slane %v826_v6, 4  ;;  %v591_v61 = vadd.f32 %v590_v34, %v1228_v14 }
  0xc9   :  { %v639_v41 = vmul.f32 %v638_v10, %v1225_v8  ;;  %v687_v30 = vmul.f32 %v981_v59, %v685_v18  ;;  %v734_v32 = vadd.f32 %v733_v57, %v732_v63  ;;  %v782_v46 = vrot.slane %v781_v5, 1 }
  0xca   :  { %v818_v3 = vrot.slane %v817_v54, 2  ;;  %v828_v9 = vadd.f32 %v827_v16, %v826_v6  ;;  %v546_v52 = vadd.f32 %v545_v60, %v497_v17  ;;  %v594_v48 = vmul.f32 %v593_v20, %v591_v61 }
  0xcb   :  { %v640_v31 = vadd.f32 %v639_v41, %v1228_v14  ;;  %v642_v0 = vstv %s1551_s7  ;;  %v688_v62 = vmul.f32 %v687_v30, %v1225_v8  ;;  %v783_v4 = vadd.f32 %v782_v46, %v781_v5 }
  0xcc   :  { %v819_v38 = vadd.f32 %v818_v3, %v817_v54  ;;  %v983_v47 = vpop.eup %982  ;;  %v829_v12 = vrot.slane %v828_v9, 2  ;;  %v595_v51 = vadd.f32 %v594_v48, %v546_v52  ;;  %v691_v19 = vstv %s886_s8 }
  0xcd   :  { %v736_v26 = vmul.f32 %v983_v47, %v734_v32  ;;  %v643_v22 = vmul.f32 %v642_v0, %v640_v31  ;;  %v689_v42 = vadd.f32 %v688_v62, %v1228_v14  ;;  %v740_v27 = vstv %s887_s9 }
  0xce   :  { %v820_v24 = vrot.slane %v819_v38, 1  ;;  %v830_v49 = vadd.f32 %v829_v12, %v828_v9  ;;  %v789_v21 = vstv %s888_s10  ;;  %v838_v55 = vstv %s889_s11 }
  0xcf   :  { %v737_v23 = vmul.f32 %v736_v26, %v1225_v8  ;;  %v644_v37 = vadd.f32 %v643_v22, %v595_v51  ;;  %v692_v13 = vmul.f32 %v691_v19, %v689_v42  ;;  %v841_v33 = vstv %s873_s12 }
  0xd0   :  { %v821_v44 = vadd.f32 %v820_v24, %v819_v38  ;;  %v831_v45 = vrot.slane %v830_v49, 1 }
  0xd1   :  { %v738_v56 = vadd.f32 %v737_v23, %v1228_v14  ;;  %v693_v50 = vadd.f32 %v692_v13, %v644_v37 }
  0xd2   :  { %986 = vrcp.f32 %v821_v44  ;;  %v832_v29 = vadd.f32 %v831_v45, %v830_v49 }
  0xd3   :  { %v741_v28 = vmul.f32 %v740_v27, %v738_v56 }
  0xd5   :  { %v985_v15 = vpop.eup %984  ;;  %v742_v53 = vadd.f32 %v741_v28, %v693_v50 }
  0xd6   :  { %v785_v35 = vmul.f32 %v985_v15, %v783_v4 }
  0xd8   :  { %v786_v11 = vmul.f32 %v785_v35, %v1225_v8 }
  0xda   :  { %v787_v43 = vadd.f32 %v786_v11, %v1228_v14 }
  0xdc   :  { %v790_v36 = vmul.f32 %v789_v21, %v787_v43 }
  0xde   :  { %v791_v7 = vadd.f32 %v790_v36, %v742_v53 }
  0xdf   :  { %v987_v63 = vpop.eup %986 }
  0xe0   :  { %v834_v1 = vmul.f32 %v987_v63, %v832_v29 }
  0xe2   :  { %v835_v2 = vmul.f32 %v834_v1, %v1225_v8 }
  0xe4   :  { %v836_v58 = vadd.f32 %v835_v2, %v1228_v14 }
  0xe6   :  { %v839_v39 = vmul.f32 %v838_v55, %v836_v58 }
  0xe8   :  { %v840_v25 = vadd.f32 %v839_v39, %v791_v7 }
  0xea   :  { %v842_v6 = vadd.f32 %v841_v33, %v840_v25 }
  0xec   :  { %v843_v40 = vsub.f32 0.0, %v842_v6 }
  0xee   :  { %v844_v34 = vmul.f32 1.442695, %v843_v40 }
  0xf0   :  { %988 = vpow2.f32 %v844_v34 }
  0xfd   :  { %v989_v10 = vpop.eup %988 }
  0xfe   :  { %v846_v18 = vadd.f32 1.0, %v989_v10 }
 0x100   :  { %990 = vrcp.f32 %v846_v18 }
 0x10d   :  { %v991_v59 = vpop.eup %990 }
 0x10e   :  { %850 = vst.msk [vmem:[#allocation5] sm:$0x1] %vm849_vm1, %v991_v59 }
 0x10f   :  { %1015 = shalt.err (!%p1012_p9)
}
 0x110   :  { %860 = dma.vmem_to_hbm [thread:$0]  %s858_s14, 16, %s1571_s2, [#allocation3]  }
 0x111   :  { %1026 = dma.done.wait [#allocation3], 16  }
 0x112   :  { %1027 = vsyncadd [#allocation3], 4294967280 }
 0x113   :  { %864 = vsyncpa [#allocation3], 1 }
 0x114   :  { %865 = vsyncpa [#allocation4], 1 }

</bundles_post_ra>
